<compile_context>
chip_gen: v6e
topology: v6e:2x2x1
jax: 0.10.0
libtpu: 0.0.40
codegen_flags: <defaults>
</compile_context>

<pallas_src>
import functools
import math

import jax
import jax.numpy as jnp
from jax import lax
from jax.experimental import pallas as pl
from jax.experimental.pallas import tpu as pltpu

_VMEM_LIMIT = 48 * 1024 * 1024   # stays inside v7x's 64 MiB physical VMEM with headroom
_ROW_TILE = 256                  # token-row tile for matmul / fused kernels
_LN_ROW_TILE = 512               # row tile for the memory-bound output LayerNorm
_Q_TILE = 256                    # query-row tile for attention


def _compiler_params(n_grid_axes):
    return pltpu.CompilerParams(
        dimension_semantics=("parallel",) * n_grid_axes,
        vmem_limit_bytes=_VMEM_LIMIT)


def _row_tile(m, target):
    # Full array if small, otherwise a multiple-of-8 tile; a partial last block is
    # fine because every kernel below is row-wise independent (padded rows are dropped
    # on store and never feed cross-row reductions).
    return m if m <= target else target


# ----------------------------- Pallas kernels -----------------------------

def _layernorm_f32(x, g, b, eps):
    mu = jnp.mean(x, axis=-1, keepdims=True)
    var = jnp.mean(jnp.square(x - mu), axis=-1, keepdims=True)
    return (x - mu) * lax.rsqrt(var + eps) * g + b


def _linear_kernel(x_ref, w_ref, b_ref, o_ref, *, activation):
    y = jnp.dot(x_ref[...].astype(jnp.bfloat16), w_ref[...],
                preferred_element_type=jnp.float32) + b_ref[...]
    if activation == "gelu":
        # TODO(synk): HF DINOv2 uses exact (erf) GELU; tanh-approx is used for Mosaic lowering.
        y = jax.nn.gelu(y, approximate=True)
    o_ref[...] = y.astype(o_ref.dtype)


def _layernorm_kernel(x_ref, g_ref, b_ref, o_ref, *, eps):
    x = x_ref[...].astype(jnp.float32)
    o_ref[...] = _layernorm_f32(x, g_ref[...], b_ref[...], eps).astype(o_ref.dtype)


def _ln_qkv_kernel(x_ref, g_ref, b_ref, wq_ref, bq_ref, wk_ref, bk_ref,
                   wv_ref, bv_ref, q_ref, k_ref, v_ref, *, eps):
    n = _layernorm_f32(x_ref[...].astype(jnp.float32), g_ref[...], b_ref[...], eps)
    nb = n.astype(jnp.bfloat16)
    q_ref[...] = (jnp.dot(nb, wq_ref[...], preferred_element_type=jnp.float32)
                  + bq_ref[...]).astype(q_ref.dtype)
    k_ref[...] = (jnp.dot(nb, wk_ref[...], preferred_element_type=jnp.float32)
                  + bk_ref[...]).astype(k_ref.dtype)
    v_ref[...] = (jnp.dot(nb, wv_ref[...], preferred_element_type=jnp.float32)
                  + bv_ref[...]).astype(v_ref.dtype)


def _proj_scale_residual_kernel(x_ref, w_ref, b_ref, s_ref, r_ref, o_ref):
    # out = residual + layer_scale * (x @ w + b)
    y = jnp.dot(x_ref[...].astype(jnp.bfloat16), w_ref[...],
                preferred_element_type=jnp.float32) + b_ref[...]
    o_ref[...] = (r_ref[...] + s_ref[...] * y).astype(o_ref.dtype)


def _ln_mlp_residual_kernel(x_ref, g_ref, b_ref, w1_ref, b1_ref, w2_ref, b2_ref,
                            s_ref, o_ref, *, eps):
    # out = x + layer_scale * fc2(gelu(fc1(LN(x))))   (fc1 activation never hits HBM)
    x = x_ref[...].astype(jnp.float32)
    n = _layernorm_f32(x, g_ref[...], b_ref[...], eps)
    h = jnp.dot(n.astype(jnp.bfloat16), w1_ref[...],
                preferred_element_type=jnp.float32) + b1_ref[...]
    # TODO(synk): HF DINOv2 uses exact (erf) GELU; tanh-approx is used for Mosaic lowering.
    h = jax.nn.gelu(h, approximate=True)
    y = jnp.dot(h.astype(jnp.bfloat16), w2_ref[...],
                preferred_element_type=jnp.float32) + b2_ref[...]
    o_ref[...] = (x + s_ref[...] * y).astype(o_ref.dtype)


def _attention_kernel(q_ref, k_ref, v_ref, o_ref, *, nh, dh, scale):
    # Blocks: q/o (1, tq, D), k/v (1, S, D). Heads are static lane slices in-kernel.
    q_all = q_ref[0].astype(jnp.float32)
    k_all = k_ref[0].astype(jnp.bfloat16)
    v_all = v_ref[0].astype(jnp.bfloat16)
    outs = []
    for h in range(nh):                      # static unroll over heads (nh is small)
        lo, hi = h * dh, (h + 1) * dh
        q = (q_all[:, lo:hi] * scale).astype(jnp.bfloat16)   # fold scale into q
        k = k_all[:, lo:hi]
        v = v_all[:, lo:hi]
        s = lax.dot_general(q, k, (((1,), (1,)), ((), ())),   # q @ k.T, no K^T copy
                            preferred_element_type=jnp.float32)
        m = jnp.max(s, axis=-1, keepdims=True)
        p = jnp.exp(s - m)
        l = jnp.sum(p, axis=-1, keepdims=True)
        ctx = lax.dot_general(p.astype(jnp.bfloat16), v, (((1,), (0,)), ((), ())),
                              preferred_element_type=jnp.float32)
        outs.append(ctx * pl.reciprocal(l, approx=True))
    # Single lane-dense (tq, D) store instead of per-head sub-128-lane masked stores.
    o_ref[0] = jnp.concatenate(outs, axis=-1).astype(o_ref.dtype)


# ----------------------------- Pallas wrappers -----------------------------

def pallas_linear(x, w, b, activation=None):
    M, K = x.shape
    N = w.shape[1]
    tm = _row_tile(M, _ROW_TILE)
    return pl.pallas_call(
        functools.partial(_linear_kernel, activation=activation),
        out_shape=jax.ShapeDtypeStruct((M, N), jnp.float32),
        grid=(pl.cdiv(M, tm),),
        in_specs=[pl.BlockSpec((tm, K), lambda i: (i, 0)),
                  pl.BlockSpec((K, N), lambda i: (0, 0)),
                  pl.BlockSpec((1, N), lambda i: (0, 0))],
        out_specs=pl.BlockSpec((tm, N), lambda i: (i, 0)),
        compiler_params=_compiler_params(1),
    )(x, w, b)


def pallas_layernorm(x, gamma, beta, eps):
    M, D = x.shape
    tm = _row_tile(M, _LN_ROW_TILE)
    return pl.pallas_call(
        functools.partial(_layernorm_kernel, eps=eps),
        out_shape=jax.ShapeDtypeStruct((M, D), x.dtype),
        grid=(pl.cdiv(M, tm),),
        in_specs=[pl.BlockSpec((tm, D), lambda i: (i, 0)),
                  pl.BlockSpec((1, D), lambda i: (0, 0)),
                  pl.BlockSpec((1, D), lambda i: (0, 0))],
        out_specs=pl.BlockSpec((tm, D), lambda i: (i, 0)),
        compiler_params=_compiler_params(1),
    )(x, gamma, beta)


def pallas_ln_qkv(x, g, b, wq, bq, wk, bk, wv, bv, eps):
    M, D = x.shape
    tm = _row_tile(M, _ROW_TILE)
    row = pl.BlockSpec((tm, D), lambda i: (i, 0))
    vec = pl.BlockSpec((1, D), lambda i: (0, 0))
    wsp = pl.BlockSpec((D, D), lambda i: (0, 0))
    out = jax.ShapeDtypeStruct((M, D), jnp.float32)
    return pl.pallas_call(
        functools.partial(_ln_qkv_kernel, eps=eps),
        out_shape=(out, out, out),
        grid=(pl.cdiv(M, tm),),
        in_specs=[row, vec, vec, wsp, vec, wsp, vec, wsp, vec],
        out_specs=(row, row, row),
        compiler_params=_compiler_params(1),
    )(x, g, b, wq, bq, wk, bk, wv, bv)


def pallas_proj_scale_residual(x, w, b, scale, residual):
    M, K = x.shape
    N = w.shape[1]
    tm = _row_tile(M, _ROW_TILE)
    return pl.pallas_call(
        _proj_scale_residual_kernel,
        out_shape=jax.ShapeDtypeStruct((M, N), jnp.float32),
        grid=(pl.cdiv(M, tm),),
        in_specs=[pl.BlockSpec((tm, K), lambda i: (i, 0)),
                  pl.BlockSpec((K, N), lambda i: (0, 0)),
                  pl.BlockSpec((1, N), lambda i: (0, 0)),
                  pl.BlockSpec((1, N), lambda i: (0, 0)),
                  pl.BlockSpec((tm, N), lambda i: (i, 0))],
        out_specs=pl.BlockSpec((tm, N), lambda i: (i, 0)),
        input_output_aliases={4: 0},     # residual buffer reused as the output buffer
        compiler_params=_compiler_params(1),
    )(x, w, b, scale, residual)


def pallas_ln_mlp_residual(x, g, b, w1, b1, w2, b2, scale, eps):
    M, D = x.shape
    Dm = w1.shape[1]
    tm = _row_tile(M, _ROW_TILE)
    row = pl.BlockSpec((tm, D), lambda i: (i, 0))
    vec_d = pl.BlockSpec((1, D), lambda i: (0, 0))
    return pl.pallas_call(
        functools.partial(_ln_mlp_residual_kernel, eps=eps),
        out_shape=jax.ShapeDtypeStruct((M, D), jnp.float32),
        grid=(pl.cdiv(M, tm),),
        in_specs=[row, vec_d, vec_d,
                  pl.BlockSpec((D, Dm), lambda i: (0, 0)),
                  pl.BlockSpec((1, Dm), lambda i: (0, 0)),
                  pl.BlockSpec((Dm, D), lambda i: (0, 0)),
                  vec_d, vec_d],
        out_specs=row,
        input_output_aliases={0: 0},     # x is also the residual; reuse its buffer
        compiler_params=_compiler_params(1),
    )(x, g, b, w1, b1, w2, b2, scale)


def pallas_attention(q, k, v, nh, scale):
    B, S, D = q.shape
    dh = D // nh
    tq = _row_tile(S, _Q_TILE)
    q_spec = pl.BlockSpec((1, tq, D), lambda b, i: (b, i, 0))
    kv_spec = pl.BlockSpec((1, S, D), lambda b, i: (b, 0, 0))   # resident across q tiles
    return pl.pallas_call(
        functools.partial(_attention_kernel, nh=nh, dh=dh, scale=scale),
        out_shape=jax.ShapeDtypeStruct((B, S, D), jnp.float32),
        grid=(B, pl.cdiv(S, tq)),
        in_specs=[q_spec, kv_spec, kv_spec],
        out_specs=q_spec,
        compiler_params=_compiler_params(2),
    )(q, k, v)


# ----------------------------- DinoV2 model -----------------------------

def init_params(key, cfg):
    D = cfg["hidden"]
    C = cfg["in_channels"]
    p = cfg["patch_size"]
    Np = (cfg["image_size"] // p) ** 2
    Dm = cfg["mlp_hidden"]

    def normal(k, shape, scale=0.02, dtype=jnp.float32):
        return (scale * jax.random.normal(k, shape)).astype(dtype)

    keys = jax.random.split(key, 8 + cfg["num_layers"])
    params = {
        # MXU weights stored in bf16 (f32-accumulated matmuls in-kernel).
        "patch_w": normal(keys[0], (C * p * p, D), dtype=jnp.bfloat16),
        "patch_b": jnp.zeros((1, D), jnp.float32),
        "cls_token": normal(keys[1], (1, 1, D)),
        "register_tokens": normal(keys[2], (1, cfg["num_registers"], D)),
        "pos_embed": normal(keys[3], (1, 1 + Np, D)),
        "out_ln_g": jnp.ones((1, D), jnp.float32),     # backbone apply_layernorm
        "out_ln_b": jnp.zeros((1, D), jnp.float32),
        "layers": [],
    }
    for li in range(cfg["num_layers"]):
        lk = jax.random.split(keys[8 + li], 6)
        params["layers"].append({
            "ln1_g": jnp.ones((1, D), jnp.float32), "ln1_b": jnp.zeros((1, D), jnp.float32),
            "q_w": normal(lk[0], (D, D), dtype=jnp.bfloat16), "q_b": jnp.zeros((1, D), jnp.float32),
            "k_w": normal(lk[1], (D, D), dtype=jnp.bfloat16), "k_b": jnp.zeros((1, D), jnp.float32),
            "v_w": normal(lk[2], (D, D), dtype=jnp.bfloat16), "v_b": jnp.zeros((1, D), jnp.float32),
            "o_w": normal(lk[3], (D, D), dtype=jnp.bfloat16), "o_b": jnp.zeros((1, D), jnp.float32),
            "ls1": jnp.full((1, D), 1.0, jnp.float32),        # DINOv2 layer_scale init = 1.0
            "ln2_g": jnp.ones((1, D), jnp.float32), "ln2_b": jnp.zeros((1, D), jnp.float32),
            "fc1_w": normal(lk[4], (D, Dm), dtype=jnp.bfloat16), "fc1_b": jnp.zeros((1, Dm), jnp.float32),
            "fc2_w": normal(lk[5], (Dm, D), dtype=jnp.bfloat16), "fc2_b": jnp.zeros((1, D), jnp.float32),
            "ls2": jnp.full((1, D), 1.0, jnp.float32),
        })
    return params


def dinov2_forward(x, params, cfg):
    # Mirrors DinoV2.forward: assert /14, run the DINOv2-with-registers backbone,
    # return the list of selected-stage feature maps (NCHW).
    assert x.shape[2] % 14 == 0 and x.shape[3] % 14 == 0, (
        f"Dinov2 requires input shape to be divisible by 14, but got {x.shape}")

    B, C, H, W = x.shape
    p = cfg["patch_size"]
    D = cfg["hidden"]
    nh = cfg["heads"]
    dh = D // nh
    eps = cfg["layer_norm_eps"]
    Hp, Wp = H // p, W // p
    Np = Hp * Wp
    nreg = cfg["num_registers"]

    # --- patch embedding (conv 14x14 stride 14 == matmul over flattened patches) ---
    patches = x.reshape(B, C, Hp, p, Wp, p).transpose(0, 2, 4, 1, 3, 5)
    patches = patches.reshape(B * Np, C * p * p)                 # (C, kh, kw) ordering, as in Conv2d
    tok = pallas_linear(patches, params["patch_w"], params["patch_b"]).reshape(B, Np, D)

    # --- cls + pos-embed + register tokens (HF Dinov2WithRegistersEmbeddings) ---
    # TODO(synk): no bicubic pos-embed interpolation; assumes Np == pretrained num_positions.
    cls = jnp.broadcast_to(params["cls_token"], (B, 1, D))
    emb = jnp.concatenate([cls, tok], axis=1) + params["pos_embed"]
    reg = jnp.broadcast_to(params["register_tokens"], (B, nreg, D))
    emb = jnp.concatenate([emb[:, :1], reg, emb[:, 1:]], axis=1)
    S = emb.shape[1]
    M = B * S

    hs = emb.reshape(M, D)
    feature_maps = []
    for li, lp in enumerate(params["layers"]):
        # TODO(synk): windowed attention (num_windows=4) for non-output blocks is not
        #             partitioned; every block uses global attention here.

        # --- attention block: fused LN1+QKV, head-sliced attention, fused proj+scale+residual ---
        q, k, v = pallas_ln_qkv(hs, lp["ln1_g"], lp["ln1_b"],
                                lp["q_w"], lp["q_b"], lp["k_w"], lp["k_b"],
                                lp["v_w"], lp["v_b"], eps)
        ctx = pallas_attention(q.reshape(B, S, D), k.reshape(B, S, D), v.reshape(B, S, D),
                               nh, 1.0 / math.sqrt(dh))
        hs1 = pallas_proj_scale_residual(ctx.reshape(M, D), lp["o_w"], lp["o_b"],
                                         lp["ls1"], hs)

        # --- MLP block: fused LN2 + fc1 + GELU + fc2 + layer-scale + residual ---
        hs = pallas_ln_mlp_residual(hs1, lp["ln2_g"], lp["ln2_b"],
                                    lp["fc1_w"], lp["fc1_b"],
                                    lp["fc2_w"], lp["fc2_b"], lp["ls2"], eps)

        # stage{li+1} selected -> backbone layernorm, drop cls+registers, reshape to NCHW
        if (li + 1) in cfg["out_feature_indexes"]:
            hn = pallas_layernorm(hs, params["out_ln_g"], params["out_ln_b"], eps)
            hn = hn.reshape(B, S, D)[:, 1 + nreg:, :]
            fm = hn.reshape(B, Hp, Wp, D).transpose(0, 3, 1, 2)
            feature_maps.append(fm)

    return feature_maps


# ----------------------------- main -----------------------------

if __name__ == "__main__":
    cfg = dict(
        in_channels=3,
        image_size=28,            # divisible by 14
        patch_size=14,
        hidden=32,                # small stand-in for size_to_width['base']=768
        heads=2,
        mlp_hidden=128,           # 4 * hidden
        num_registers=4,
        num_layers=4,
        out_feature_indexes=[2, 4],
        layer_norm_eps=1e-6,
    )

    root = jax.random.PRNGKey(0)
    kx, kp = jax.random.split(root)
    x = jax.random.normal(kx, (2, cfg["in_channels"], cfg["image_size"], cfg["image_size"]),
                          dtype=jnp.float32)
    params = init_params(kp, cfg)

    fwd = jax.jit(functools.partial(dinov2_forward, cfg=cfg))
    feats = jax.block_until_ready(fwd(x, params))

    Hp = cfg["image_size"] // cfg["patch_size"]
    assert len(feats) == len(cfg["out_feature_indexes"])
    for f in feats:
        assert f.shape == (2, cfg["hidden"], Hp, Hp)
        assert bool(jnp.all(jnp.isfinite(f)))

    print("KERNEL_OK")
</pallas_src>

<mosaic_0001>
module attributes {stable_mosaic.version = 11 : i64} {
  func.func @_linear_kernel(%arg0: i32, %arg1: memref<8x588xf32, #tpu.memory_space<vmem>>, %arg2: memref<588x32xbf16, #tpu.memory_space<vmem>>, %arg3: memref<1x32xf32, #tpu.memory_space<vmem>>, %arg4: memref<8x32xf32, #tpu.memory_space<vmem>>) attributes {dimension_semantics = [#tpu.dimension_semantics<parallel>], iteration_bounds = array<i64: 1>, scalar_prefetch = 0 : i64, scratch_operands = 0 : i64, tpu.core_type = #tpu.core_type<tc>, window_params = [{transform_indices = @transform_0, window_bounds = array<i64: 8, 588>}, {pipeline_mode = #tpu.pipeline_mode<synchronous>, transform_indices = @transform_1, window_bounds = array<i64: 588, 32>}, {pipeline_mode = #tpu.pipeline_mode<synchronous>, transform_indices = @transform_2, window_bounds = array<i64: 1, 32>}, {transform_indices = @transform_3, window_bounds = array<i64: 8, 32>}]} {
    %c0 = arith.constant 0 : index
    %c0_0 = arith.constant 0 : index
    %0 = vector.load %arg1[%c0, %c0_0] : memref<8x588xf32, #tpu.memory_space<vmem>>, vector<8x588xf32>
    %1 = arith.truncf %0 : vector<8x588xf32> to vector<8x588xbf16>
    %c0_1 = arith.constant 0 : index
    %c0_2 = arith.constant 0 : index
    %2 = vector.load %arg2[%c0_1, %c0_2] : memref<588x32xbf16, #tpu.memory_space<vmem>>, vector<588x32xbf16>
    %cst = arith.constant dense<0.000000e+00> : vector<8x32xf32>
    %3 = tpu.matmul %1, %2, %cst {dimension_numbers = #tpu.dot_dimension_numbers<[1], [0], [0], [1], [0, 0, 1, 1], [], []>} : vector<8x588xbf16>, vector<588x32xbf16>, vector<8x32xf32> -> vector<8x32xf32>
    %c0_3 = arith.constant 0 : index
    %c0_4 = arith.constant 0 : index
    %4 = vector.load %arg3[%c0_3, %c0_4] : memref<1x32xf32, #tpu.memory_space<vmem>>, vector<1x32xf32>
    %5 = vector.broadcast %4 : vector<1x32xf32> to vector<8x32xf32>
    %6 = arith.addf %3, %5 : vector<8x32xf32>
    %c0_5 = arith.constant 0 : index
    %c0_6 = arith.constant 0 : index
    %7 = vector.load %arg4[%c0_5, %c0_6] : memref<8x32xf32, #tpu.memory_space<vmem>>, vector<8x32xf32>
    tpu.vector_store %arg4[%c0_5, %c0_6], %6 {strides = array<i32>} : memref<8x32xf32, #tpu.memory_space<vmem>>, vector<8x32xf32>,
    return
  }
  func.func @transform_0(%arg0: i32) -> (i32, i32) {
    %c0_i32 = arith.constant 0 : i32
    %c0_i32_0 = arith.constant 0 : i32
    return %arg0, %c0_i32 : i32, i32
  }
  func.func @transform_1(%arg0: i32) -> (i32, i32) {
    %c0_i32 = arith.constant 0 : i32
    %c0_i32_0 = arith.constant 0 : i32
    %c0_i32_1 = arith.constant 0 : i32
    return %c0_i32, %c0_i32_0 : i32, i32
  }
  func.func @transform_2(%arg0: i32) -> (i32, i32) {
    %c0_i32 = arith.constant 0 : i32
    %c0_i32_0 = arith.constant 0 : i32
    %c0_i32_1 = arith.constant 0 : i32
    return %c0_i32, %c0_i32_0 : i32, i32
  }
  func.func @transform_3(%arg0: i32) -> (i32, i32) {
    %c0_i32 = arith.constant 0 : i32
    %c0_i32_0 = arith.constant 0 : i32
    return %arg0, %c0_i32 : i32, i32
  }
}

module attributes {stable_mosaic.version = 11 : i64} {
  func.func @_ln_qkv_kernel(%arg0: i32, %arg1: memref<18x32xf32, #tpu.memory_space<vmem>>, %arg2: memref<1x32xf32, #tpu.memory_space<vmem>>, %arg3: memref<1x32xf32, #tpu.memory_space<vmem>>, %arg4: memref<32x32xbf16, #tpu.memory_space<vmem>>, %arg5: memref<1x32xf32, #tpu.memory_space<vmem>>, %arg6: memref<32x32xbf16, #tpu.memory_space<vmem>>, %arg7: memref<1x32xf32, #tpu.memory_space<vmem>>, %arg8: memref<32x32xbf16, #tpu.memory_space<vmem>>, %arg9: memref<1x32xf32, #tpu.memory_space<vmem>>, %arg10: memref<18x32xf32, #tpu.memory_space<vmem>>, %arg11: memref<18x32xf32, #tpu.memory_space<vmem>>, %arg12: memref<18x32xf32, #tpu.memory_space<vmem>>) attributes {dimension_semantics = [#tpu.dimension_semantics<parallel>], iteration_bounds = array<i64: 1>, scalar_prefetch = 0 : i64, scratch_operands = 0 : i64, tpu.core_type = #tpu.core_type<tc>, window_params = [{transform_indices = @transform_0, window_bounds = array<i64: 18, 32>}, {pipeline_mode = #tpu.pipeline_mode<synchronous>, transform_indices = @transform_1, window_bounds = array<i64: 1, 32>}, {pipeline_mode = #tpu.pipeline_mode<synchronous>, transform_indices = @transform_2, window_bounds = array<i64: 1, 32>}, {pipeline_mode = #tpu.pipeline_mode<synchronous>, transform_indices = @transform_3, window_bounds = array<i64: 32, 32>}, {pipeline_mode = #tpu.pipeline_mode<synchronous>, transform_indices = @transform_4, window_bounds = array<i64: 1, 32>}, {pipeline_mode = #tpu.pipeline_mode<synchronous>, transform_indices = @transform_5, window_bounds = array<i64: 32, 32>}, {pipeline_mode = #tpu.pipeline_mode<synchronous>, transform_indices = @transform_6, window_bounds = array<i64: 1, 32>}, {pipeline_mode = #tpu.pipeline_mode<synchronous>, transform_indices = @transform_7, window_bounds = array<i64: 32, 32>}, {pipeline_mode = #tpu.pipeline_mode<synchronous>, transform_indices = @transform_8, window_bounds = array<i64: 1, 32>}, {transform_indices = @transform_9, window_bounds = array<i64: 18, 32>}, {transform_indices = @transform_10, window_bounds = array<i64: 18, 32>}, {transform_indices = @transform_11, window_bounds = array<i64: 18, 32>}]} {
    %c0 = arith.constant 0 : index
    %c0_0 = arith.constant 0 : index
    %0 = vector.load %arg1[%c0, %c0_0] : memref<18x32xf32, #tpu.memory_space<vmem>>, vector<18x32xf32>
    %c0_1 = arith.constant 0 : index
    %c0_2 = arith.constant 0 : index
    %1 = vector.load %arg2[%c0_1, %c0_2] : memref<1x32xf32, #tpu.memory_space<vmem>>, vector<1x32xf32>
    %c0_3 = arith.constant 0 : index
    %c0_4 = arith.constant 0 : index
    %2 = vector.load %arg3[%c0_3, %c0_4] : memref<1x32xf32, #tpu.memory_space<vmem>>, vector<1x32xf32>
    %cst = arith.constant dense<0.000000e+00> : vector<18xf32>
    %3 = vector.multi_reduction <add>, %0, %cst [1] : vector<18x32xf32> to vector<18xf32>
    %4 = vector.shape_cast %3 : vector<18xf32> to vector<18x1xf32>
    %cst_5 = arith.constant 3.200000e+01 : f32
    %5 = vector.broadcast %cst_5 : f32 to vector<18x1xf32>
    %6 = arith.divf %4, %5 : vector<18x1xf32>
    %7 = vector.broadcast %6 : vector<18x1xf32> to vector<18x32xf32>
    %8 = arith.subf %0, %7 : vector<18x32xf32>
    %9 = arith.mulf %8, %8 : vector<18x32xf32>
    %cst_6 = arith.constant dense<0.000000e+00> : vector<18xf32>
    %10 = vector.multi_reduction <add>, %9, %cst_6 [1] : vector<18x32xf32> to vector<18xf32>
    %11 = vector.shape_cast %10 : vector<18xf32> to vector<18x1xf32>
    %cst_7 = arith.constant 3.200000e+01 : f32
    %12 = vector.broadcast %cst_7 : f32 to vector<18x1xf32>
    %13 = arith.divf %11, %12 : vector<18x1xf32>
    %14 = vector.broadcast %6 : vector<18x1xf32> to vector<18x32xf32>
    %15 = arith.subf %0, %14 : vector<18x32xf32>
    %cst_8 = arith.constant 9.99999997E-7 : f32
    %16 = vector.broadcast %cst_8 : f32 to vector<18x1xf32>
    %17 = arith.addf %13, %16 : vector<18x1xf32>
    %18 = math.rsqrt %17 : vector<18x1xf32>
    %19 = vector.broadcast %18 : vector<18x1xf32> to vector<18x32xf32>
    %20 = arith.mulf %15, %19 : vector<18x32xf32>
    %21 = vector.broadcast %1 : vector<1x32xf32> to vector<18x32xf32>
    %22 = arith.mulf %20, %21 : vector<18x32xf32>
    %23 = vector.broadcast %2 : vector<1x32xf32> to vector<18x32xf32>
    %24 = arith.addf %22, %23 : vector<18x32xf32>
    %25 = arith.truncf %24 : vector<18x32xf32> to vector<18x32xbf16>
    %c0_9 = arith.constant 0 : index
    %c0_10 = arith.constant 0 : index
    %26 = vector.load %arg4[%c0_9, %c0_10] : memref<32x32xbf16, #tpu.memory_space<vmem>>, vector<32x32xbf16>
    %cst_11 = arith.constant dense<0.000000e+00> : vector<18x32xf32>
    %27 = tpu.matmul %25, %26, %cst_11 {dimension_numbers = #tpu.dot_dimension_numbers<[1], [0], [0], [1], [0, 0, 1, 1], [], []>} : vector<18x32xbf16>, vector<32x32xbf16>, vector<18x32xf32> -> vector<18x32xf32>
    %c0_12 = arith.constant 0 : index
    %c0_13 = arith.constant 0 : index
    %28 = vector.load %arg5[%c0_12, %c0_13] : memref<1x32xf32, #tpu.memory_space<vmem>>, vector<1x32xf32>
    %29 = vector.broadcast %28 : vector<1x32xf32> to vector<18x32xf32>
    %30 = arith.addf %27, %29 : vector<18x32xf32>
    %c0_14 = arith.constant 0 : index
    %c0_15 = arith.constant 0 : index
    %31 = vector.load %arg10[%c0_14, %c0_15] : memref<18x32xf32, #tpu.memory_space<vmem>>, vector<18x32xf32>
    tpu.vector_store %arg10[%c0_14, %c0_15], %30 {strides = array<i32>} : memref<18x32xf32, #tpu.memory_space<vmem>>, vector<18x32xf32>,
    %c0_16 = arith.constant 0 : index
    %c0_17 = arith.constant 0 : index
    %32 = vector.load %arg6[%c0_16, %c0_17] : memref<32x32xbf16, #tpu.memory_space<vmem>>, vector<32x32xbf16>
    %cst_18 = arith.constant dense<0.000000e+00> : vector<18x32xf32>
    %33 = tpu.matmul %25, %32, %cst_18 {dimension_numbers = #tpu.dot_dimension_numbers<[1], [0], [0], [1], [0, 0, 1, 1], [], []>} : vector<18x32xbf16>, vector<32x32xbf16>, vector<18x32xf32> -> vector<18x32xf32>
    %c0_19 = arith.constant 0 : index
    %c0_20 = arith.constant 0 : index
    %34 = vector.load %arg7[%c0_19, %c0_20] : memref<1x32xf32, #tpu.memory_space<vmem>>, vector<1x32xf32>
    %35 = vector.broadcast %34 : vector<1x32xf32> to vector<18x32xf32>
    %36 = arith.addf %33, %35 : vector<18x32xf32>
    %c0_21 = arith.constant 0 : index
    %c0_22 = arith.constant 0 : index
    %37 = vector.load %arg11[%c0_21, %c0_22] : memref<18x32xf32, #tpu.memory_space<vmem>>, vector<18x32xf32>
    tpu.vector_store %arg11[%c0_21, %c0_22], %36 {strides = array<i32>} : memref<18x32xf32, #tpu.memory_space<vmem>>, vector<18x32xf32>,
    %c0_23 = arith.constant 0 : index
    %c0_24 = arith.constant 0 : index
    %38 = vector.load %arg8[%c0_23, %c0_24] : memref<32x32xbf16, #tpu.memory_space<vmem>>, vector<32x32xbf16>
    %cst_25 = arith.constant dense<0.000000e+00> : vector<18x32xf32>
    %39 = tpu.matmul %25, %38, %cst_25 {dimension_numbers = #tpu.dot_dimension_numbers<[1], [0], [0], [1], [0, 0, 1, 1], [], []>} : vector<18x32xbf16>, vector<32x32xbf16>, vector<18x32xf32> -> vector<18x32xf32>
    %c0_26 = arith.constant 0 : index
    %c0_27 = arith.constant 0 : index
    %40 = vector.load %arg9[%c0_26, %c0_27] : memref<1x32xf32, #tpu.memory_space<vmem>>, vector<1x32xf32>
    %41 = vector.broadcast %40 : vector<1x32xf32> to vector<18x32xf32>
    %42 = arith.addf %39, %41 : vector<18x32xf32>
    %c0_28 = arith.constant 0 : index
    %c0_29 = arith.constant 0 : index
    %43 = vector.load %arg12[%c0_28, %c0_29] : memref<18x32xf32, #tpu.memory_space<vmem>>, vector<18x32xf32>
    tpu.vector_store %arg12[%c0_28, %c0_29], %42 {strides = array<i32>} : memref<18x32xf32, #tpu.memory_space<vmem>>, vector<18x32xf32>,
    return
  }
  func.func @transform_0(%arg0: i32) -> (i32, i32) {
    %c0_i32 = arith.constant 0 : i32
    %c0_i32_0 = arith.constant 0 : i32
    return %arg0, %c0_i32 : i32, i32
  }
  func.func @transform_1(%arg0: i32) -> (i32, i32) {
    %c0_i32 = arith.constant 0 : i32
    %c0_i32_0 = arith.constant 0 : i32
    %c0_i32_1 = arith.constant 0 : i32
    return %c0_i32, %c0_i32_0 : i32, i32
  }
  func.func @transform_2(%arg0: i32) -> (i32, i32) {
    %c0_i32 = arith.constant 0 : i32
    %c0_i32_0 = arith.constant 0 : i32
    %c0_i32_1 = arith.constant 0 : i32
    return %c0_i32, %c0_i32_0 : i32, i32
  }
  func.func @transform_3(%arg0: i32) -> (i32, i32) {
    %c0_i32 = arith.constant 0 : i32
    %c0_i32_0 = arith.constant 0 : i32
    %c0_i32_1 = arith.constant 0 : i32
    return %c0_i32, %c0_i32_0 : i32, i32
  }
  func.func @transform_4(%arg0: i32) -> (i32, i32) {
    %c0_i32 = arith.constant 0 : i32
    %c0_i32_0 = arith.constant 0 : i32
    %c0_i32_1 = arith.constant 0 : i32
    return %c0_i32, %c0_i32_0 : i32, i32
  }
  func.func @transform_5(%arg0: i32) -> (i32, i32) {
    %c0_i32 = arith.constant 0 : i32
    %c0_i32_0 = arith.constant 0 : i32
    %c0_i32_1 = arith.constant 0 : i32
    return %c0_i32, %c0_i32_0 : i32, i32
  }
  func.func @transform_6(%arg0: i32) -> (i32, i32) {
    %c0_i32 = arith.constant 0 : i32
    %c0_i32_0 = arith.constant 0 : i32
    %c0_i32_1 = arith.constant 0 : i32
    return %c0_i32, %c0_i32_0 : i32, i32
  }
  func.func @transform_7(%arg0: i32) -> (i32, i32) {
    %c0_i32 = arith.constant 0 : i32
    %c0_i32_0 = arith.constant 0 : i32
    %c0_i32_1 = arith.constant 0 : i32
    return %c0_i32, %c0_i32_0 : i32, i32
  }
  func.func @transform_8(%arg0: i32) -> (i32, i32) {
    %c0_i32 = arith.constant 0 : i32
    %c0_i32_0 = arith.constant 0 : i32
    %c0_i32_1 = arith.constant 0 : i32
    return %c0_i32, %c0_i32_0 : i32, i32
  }
  func.func @transform_9(%arg0: i32) -> (i32, i32) {
    %c0_i32 = arith.constant 0 : i32
    %c0_i32_0 = arith.constant 0 : i32
    return %arg0, %c0_i32 : i32, i32
  }
  func.func @transform_10(%arg0: i32) -> (i32, i32) {
    %c0_i32 = arith.constant 0 : i32
    %c0_i32_0 = arith.constant 0 : i32
    return %arg0, %c0_i32 : i32, i32
  }
  func.func @transform_11(%arg0: i32) -> (i32, i32) {
    %c0_i32 = arith.constant 0 : i32
    %c0_i32_0 = arith.constant 0 : i32
    return %arg0, %c0_i32 : i32, i32
  }
}

module attributes {stable_mosaic.version = 11 : i64} {
  func.func @_proj_scale_residual_kernel(%arg0: i32, %arg1: memref<18x32xf32, #tpu.memory_space<vmem>>, %arg2: memref<32x32xbf16, #tpu.memory_space<vmem>>, %arg3: memref<1x32xf32, #tpu.memory_space<vmem>>, %arg4: memref<1x32xf32, #tpu.memory_space<vmem>>, %arg5: memref<18x32xf32, #tpu.memory_space<vmem>>, %arg6: memref<18x32xf32, #tpu.memory_space<vmem>>) attributes {dimension_semantics = [#tpu.dimension_semantics<parallel>], iteration_bounds = array<i64: 1>, scalar_prefetch = 0 : i64, scratch_operands = 0 : i64, tpu.core_type = #tpu.core_type<tc>, window_params = [{transform_indices = @transform_0, window_bounds = array<i64: 18, 32>}, {pipeline_mode = #tpu.pipeline_mode<synchronous>, transform_indices = @transform_1, window_bounds = array<i64: 32, 32>}, {pipeline_mode = #tpu.pipeline_mode<synchronous>, transform_indices = @transform_2, window_bounds = array<i64: 1, 32>}, {pipeline_mode = #tpu.pipeline_mode<synchronous>, transform_indices = @transform_3, window_bounds = array<i64: 1, 32>}, {transform_indices = @transform_4, window_bounds = array<i64: 18, 32>}, {transform_indices = @transform_5, window_bounds = array<i64: 18, 32>}]} {
    %c0 = arith.constant 0 : index
    %c0_0 = arith.constant 0 : index
    %0 = vector.load %arg1[%c0, %c0_0] : memref<18x32xf32, #tpu.memory_space<vmem>>, vector<18x32xf32>
    %1 = arith.truncf %0 : vector<18x32xf32> to vector<18x32xbf16>
    %c0_1 = arith.constant 0 : index
    %c0_2 = arith.constant 0 : index
    %2 = vector.load %arg2[%c0_1, %c0_2] : memref<32x32xbf16, #tpu.memory_space<vmem>>, vector<32x32xbf16>
    %cst = arith.constant dense<0.000000e+00> : vector<18x32xf32>
    %3 = tpu.matmul %1, %2, %cst {dimension_numbers = #tpu.dot_dimension_numbers<[1], [0], [0], [1], [0, 0, 1, 1], [], []>} : vector<18x32xbf16>, vector<32x32xbf16>, vector<18x32xf32> -> vector<18x32xf32>
    %c0_3 = arith.constant 0 : index
    %c0_4 = arith.constant 0 : index
    %4 = vector.load %arg3[%c0_3, %c0_4] : memref<1x32xf32, #tpu.memory_space<vmem>>, vector<1x32xf32>
    %5 = vector.broadcast %4 : vector<1x32xf32> to vector<18x32xf32>
    %6 = arith.addf %3, %5 : vector<18x32xf32>
    %c0_5 = arith.constant 0 : index
    %c0_6 = arith.constant 0 : index
    %7 = vector.load %arg5[%c0_5, %c0_6] : memref<18x32xf32, #tpu.memory_space<vmem>>, vector<18x32xf32>
    %c0_7 = arith.constant 0 : index
    %c0_8 = arith.constant 0 : index
    %8 = vector.load %arg4[%c0_7, %c0_8] : memref<1x32xf32, #tpu.memory_space<vmem>>, vector<1x32xf32>
    %9 = vector.broadcast %8 : vector<1x32xf32> to vector<18x32xf32>
    %10 = arith.mulf %9, %6 : vector<18x32xf32>
    %11 = arith.addf %7, %10 : vector<18x32xf32>
    %c0_9 = arith.constant 0 : index
    %c0_10 = arith.constant 0 : index
    %12 = vector.load %arg6[%c0_9, %c0_10] : memref<18x32xf32, #tpu.memory_space<vmem>>, vector<18x32xf32>
    tpu.vector_store %arg6[%c0_9, %c0_10], %11 {strides = array<i32>} : memref<18x32xf32, #tpu.memory_space<vmem>>, vector<18x32xf32>,
    return
  }
  func.func @transform_0(%arg0: i32) -> (i32, i32) {
    %c0_i32 = arith.constant 0 : i32
    %c0_i32_0 = arith.constant 0 : i32
    return %arg0, %c0_i32 : i32, i32
  }
  func.func @transform_1(%arg0: i32) -> (i32, i32) {
    %c0_i32 = arith.constant 0 : i32
    %c0_i32_0 = arith.constant 0 : i32
    %c0_i32_1 = arith.constant 0 : i32
    return %c0_i32, %c0_i32_0 : i32, i32
  }
  func.func @transform_2(%arg0: i32) -> (i32, i32) {
    %c0_i32 = arith.constant 0 : i32
    %c0_i32_0 = arith.constant 0 : i32
    %c0_i32_1 = arith.constant 0 : i32
    return %c0_i32, %c0_i32_0 : i32, i32
  }
  func.func @transform_3(%arg0: i32) -> (i32, i32) {
    %c0_i32 = arith.constant 0 : i32
    %c0_i32_0 = arith.constant 0 : i32
    %c0_i32_1 = arith.constant 0 : i32
    return %c0_i32, %c0_i32_0 : i32, i32
  }
  func.func @transform_4(%arg0: i32) -> (i32, i32) {
    %c0_i32 = arith.constant 0 : i32
    %c0_i32_0 = arith.constant 0 : i32
    return %arg0, %c0_i32 : i32, i32
  }
  func.func @transform_5(%arg0: i32) -> (i32, i32) {
    %c0_i32 = arith.constant 0 : i32
    %c0_i32_0 = arith.constant 0 : i32
    return %arg0, %c0_i32 : i32, i32
  }
}

module attributes {stable_mosaic.version = 11 : i64} {
  func.func @_attention_kernel(%arg0: i32, %arg1: i32, %arg2: memref<1x9x32xf32, #tpu.memory_space<vmem>>, %arg3: memref<1x9x32xf32, #tpu.memory_space<vmem>>, %arg4: memref<1x9x32xf32, #tpu.memory_space<vmem>>, %arg5: memref<1x9x32xf32, #tpu.memory_space<vmem>>) attributes {dimension_semantics = [#tpu.dimension_semantics<parallel>, #tpu.dimension_semantics<parallel>], iteration_bounds = array<i64: 2, 1>, scalar_prefetch = 0 : i64, scratch_operands = 0 : i64, tpu.core_type = #tpu.core_type<tc>, window_params = [{transform_indices = @transform_0, window_bounds = array<i64: 1, 9, 32>}, {transform_indices = @transform_1, window_bounds = array<i64: 1, 9, 32>}, {transform_indices = @transform_2, window_bounds = array<i64: 1, 9, 32>}, {transform_indices = @transform_3, window_bounds = array<i64: 1, 9, 32>}]} {
    %c0 = arith.constant 0 : index
    %c0_0 = arith.constant 0 : index
    %c0_1 = arith.constant 0 : index
    %0 = vector.load %arg2[%c0, %c0_0, %c0_1] : memref<1x9x32xf32, #tpu.memory_space<vmem>>, vector<1x9x32xf32>
    %1 = vector.shape_cast %0 : vector<1x9x32xf32> to vector<9x32xf32>
    %c0_2 = arith.constant 0 : index
    %c0_3 = arith.constant 0 : index
    %c0_4 = arith.constant 0 : index
    %2 = vector.load %arg3[%c0_2, %c0_3, %c0_4] : memref<1x9x32xf32, #tpu.memory_space<vmem>>, vector<1x9x32xf32>
    %3 = vector.shape_cast %2 : vector<1x9x32xf32> to vector<9x32xf32>
    %4 = arith.truncf %3 : vector<9x32xf32> to vector<9x32xbf16>
    %c0_5 = arith.constant 0 : index
    %c0_6 = arith.constant 0 : index
    %c0_7 = arith.constant 0 : index
    %5 = vector.load %arg4[%c0_5, %c0_6, %c0_7] : memref<1x9x32xf32, #tpu.memory_space<vmem>>, vector<1x9x32xf32>
    %6 = vector.shape_cast %5 : vector<1x9x32xf32> to vector<9x32xf32>
    %7 = arith.truncf %6 : vector<9x32xf32> to vector<9x32xbf16>
    %8 = vector.extract_strided_slice %1 {offsets = [0, 0], sizes = [9, 16], strides = [1, 1]} : vector<9x32xf32> to vector<9x16xf32>
    %cst = arith.constant 2.500000e-01 : f32
    %9 = vector.broadcast %cst : f32 to vector<9x16xf32>
    %10 = arith.mulf %8, %9 : vector<9x16xf32>
    %11 = arith.truncf %10 : vector<9x16xf32> to vector<9x16xbf16>
    %12 = vector.extract_strided_slice %4 {offsets = [0, 0], sizes = [9, 16], strides = [1, 1]} : vector<9x32xbf16> to vector<9x16xbf16>
    %13 = vector.extract_strided_slice %7 {offsets = [0, 0], sizes = [9, 16], strides = [1, 1]} : vector<9x32xbf16> to vector<9x16xbf16>
    %cst_8 = arith.constant dense<0.000000e+00> : vector<9x9xf32>
    %14 = tpu.matmul %11, %12, %cst_8 {dimension_numbers = #tpu.dot_dimension_numbers<[1], [1], [0], [0], [0, 0, 1, 0], [], []>} : vector<9x16xbf16>, vector<9x16xbf16>, vector<9x9xf32> -> vector<9x9xf32>
    %cst_9 = arith.constant dense<0xFF800000> : vector<9xf32>
    %15 = vector.multi_reduction <maximumf>, %14, %cst_9 [1] : vector<9x9xf32> to vector<9xf32>
    %16 = vector.shape_cast %15 : vector<9xf32> to vector<9x1xf32>
    %17 = vector.broadcast %16 : vector<9x1xf32> to vector<9x9xf32>
    %18 = arith.subf %14, %17 : vector<9x9xf32>
    %19 = math.exp %18 : vector<9x9xf32>
    %cst_10 = arith.constant dense<0.000000e+00> : vector<9xf32>
    %20 = vector.multi_reduction <add>, %19, %cst_10 [1] : vector<9x9xf32> to vector<9xf32>
    %21 = vector.shape_cast %20 : vector<9xf32> to vector<9x1xf32>
    %22 = arith.truncf %19 : vector<9x9xf32> to vector<9x9xbf16>
    %cst_11 = arith.constant dense<0.000000e+00> : vector<9x16xf32>
    %23 = tpu.matmul %22, %13, %cst_11 {dimension_numbers = #tpu.dot_dimension_numbers<[1], [0], [0], [1], [0, 0, 1, 1], [], []>} : vector<9x9xbf16>, vector<9x16xbf16>, vector<9x16xf32> -> vector<9x16xf32>
    %24 = tpu.reciprocal %21 {approx = true} : vector<9x1xf32> -> vector<9x1xf32>
    %25 = vector.broadcast %24 : vector<9x1xf32> to vector<9x16xf32>
    %26 = arith.mulf %23, %25 : vector<9x16xf32>
    %27 = vector.extract_strided_slice %1 {offsets = [0, 16], sizes = [9, 16], strides = [1, 1]} : vector<9x32xf32> to vector<9x16xf32>
    %cst_12 = arith.constant 2.500000e-01 : f32
    %28 = vector.broadcast %cst_12 : f32 to vector<9x16xf32>
    %29 = arith.mulf %27, %28 : vector<9x16xf32>
    %30 = arith.truncf %29 : vector<9x16xf32> to vector<9x16xbf16>
    %31 = vector.extract_strided_slice %4 {offsets = [0, 16], sizes = [9, 16], strides = [1, 1]} : vector<9x32xbf16> to vector<9x16xbf16>
    %32 = vector.extract_strided_slice %7 {offsets = [0, 16], sizes = [9, 16], strides = [1, 1]} : vector<9x32xbf16> to vector<9x16xbf16>
    %cst_13 = arith.constant dense<0.000000e+00> : vector<9x9xf32>
    %33 = tpu.matmul %30, %31, %cst_13 {dimension_numbers = #tpu.dot_dimension_numbers<[1], [1], [0], [0], [0, 0, 1, 0], [], []>} : vector<9x16xbf16>, vector<9x16xbf16>, vector<9x9xf32> -> vector<9x9xf32>
    %cst_14 = arith.constant dense<0xFF800000> : vector<9xf32>
    %34 = vector.multi_reduction <maximumf>, %33, %cst_14 [1] : vector<9x9xf32> to vector<9xf32>
    %35 = vector.shape_cast %34 : vector<9xf32> to vector<9x1xf32>
    %36 = vector.broadcast %35 : vector<9x1xf32> to vector<9x9xf32>
    %37 = arith.subf %33, %36 : vector<9x9xf32>
    %38 = math.exp %37 : vector<9x9xf32>
    %cst_15 = arith.constant dense<0.000000e+00> : vector<9xf32>
    %39 = vector.multi_reduction <add>, %38, %cst_15 [1] : vector<9x9xf32> to vector<9xf32>
    %40 = vector.shape_cast %39 : vector<9xf32> to vector<9x1xf32>
    %41 = arith.truncf %38 : vector<9x9xf32> to vector<9x9xbf16>
    %cst_16 = arith.constant dense<0.000000e+00> : vector<9x16xf32>
    %42 = tpu.matmul %41, %32, %cst_16 {dimension_numbers = #tpu.dot_dimension_numbers<[1], [0], [0], [1], [0, 0, 1, 1], [], []>} : vector<9x9xbf16>, vector<9x16xbf16>, vector<9x16xf32> -> vector<9x16xf32>
    %43 = tpu.reciprocal %40 {approx = true} : vector<9x1xf32> -> vector<9x1xf32>
    %44 = vector.broadcast %43 : vector<9x1xf32> to vector<9x16xf32>
    %45 = arith.mulf %42, %44 : vector<9x16xf32>
    %46 = tpu.concatenate %26, %45 in 1 : vector<9x16xf32>, vector<9x16xf32> -> vector<9x32xf32>
    %c0_17 = arith.constant 0 : index
    %c0_18 = arith.constant 0 : index
    %c0_19 = arith.constant 0 : index
    %47 = vector.load %arg5[%c0_17, %c0_18, %c0_19] : memref<1x9x32xf32, #tpu.memory_space<vmem>>, vector<1x9x32xf32>
    %48 = vector.shape_cast %47 : vector<1x9x32xf32> to vector<9x32xf32>
    %49 = vector.shape_cast %46 : vector<9x32xf32> to vector<1x9x32xf32>
    tpu.vector_store %arg5[%c0_17, %c0_18, %c0_19], %49 {strides = array<i32>} : memref<1x9x32xf32, #tpu.memory_space<vmem>>, vector<1x9x32xf32>,
    return
  }
  func.func @transform_0(%arg0: i32, %arg1: i32) -> (i32, i32, i32) {
    %c0_i32 = arith.constant 0 : i32
    %c0_i32_0 = arith.constant 0 : i32
    return %arg0, %arg1, %c0_i32 : i32, i32, i32
  }
  func.func @transform_1(%arg0: i32, %arg1: i32) -> (i32, i32, i32) {
    %c0_i32 = arith.constant 0 : i32
    %c0_i32_0 = arith.constant 0 : i32
    %c0_i32_1 = arith.constant 0 : i32
    return %arg0, %c0_i32, %c0_i32_0 : i32, i32, i32
  }
  func.func @transform_2(%arg0: i32, %arg1: i32) -> (i32, i32, i32) {
    %c0_i32 = arith.constant 0 : i32
    %c0_i32_0 = arith.constant 0 : i32
    %c0_i32_1 = arith.constant 0 : i32
    return %arg0, %c0_i32, %c0_i32_0 : i32, i32, i32
  }
  func.func @transform_3(%arg0: i32, %arg1: i32) -> (i32, i32, i32) {
    %c0_i32 = arith.constant 0 : i32
    %c0_i32_0 = arith.constant 0 : i32
    return %arg0, %arg1, %c0_i32 : i32, i32, i32
  }
}

module attributes {stable_mosaic.version = 11 : i64} {
  func.func @_layernorm_kernel(%arg0: i32, %arg1: memref<18x32xf32, #tpu.memory_space<vmem>>, %arg2: memref<1x32xf32, #tpu.memory_space<vmem>>, %arg3: memref<1x32xf32, #tpu.memory_space<vmem>>, %arg4: memref<18x32xf32, #tpu.memory_space<vmem>>) attributes {dimension_semantics = [#tpu.dimension_semantics<parallel>], iteration_bounds = array<i64: 1>, scalar_prefetch = 0 : i64, scratch_operands = 0 : i64, tpu.core_type = #tpu.core_type<tc>, window_params = [{transform_indices = @transform_0, window_bounds = array<i64: 18, 32>}, {pipeline_mode = #tpu.pipeline_mode<synchronous>, transform_indices = @transform_1, window_bounds = array<i64: 1, 32>}, {pipeline_mode = #tpu.pipeline_mode<synchronous>, transform_indices = @transform_2, window_bounds = array<i64: 1, 32>}, {transform_indices = @transform_3, window_bounds = array<i64: 18, 32>}]} {
    %c0 = arith.constant 0 : index
    %c0_0 = arith.constant 0 : index
    %0 = vector.load %arg1[%c0, %c0_0] : memref<18x32xf32, #tpu.memory_space<vmem>>, vector<18x32xf32>
    %c0_1 = arith.constant 0 : index
    %c0_2 = arith.constant 0 : index
    %1 = vector.load %arg2[%c0_1, %c0_2] : memref<1x32xf32, #tpu.memory_space<vmem>>, vector<1x32xf32>
    %c0_3 = arith.constant 0 : index
    %c0_4 = arith.constant 0 : index
    %2 = vector.load %arg3[%c0_3, %c0_4] : memref<1x32xf32, #tpu.memory_space<vmem>>, vector<1x32xf32>
    %cst = arith.constant dense<0.000000e+00> : vector<18xf32>
    %3 = vector.multi_reduction <add>, %0, %cst [1] : vector<18x32xf32> to vector<18xf32>
    %4 = vector.shape_cast %3 : vector<18xf32> to vector<18x1xf32>
    %cst_5 = arith.constant 3.200000e+01 : f32
    %5 = vector.broadcast %cst_5 : f32 to vector<18x1xf32>
    %6 = arith.divf %4, %5 : vector<18x1xf32>
    %7 = vector.broadcast %6 : vector<18x1xf32> to vector<18x32xf32>
    %8 = arith.subf %0, %7 : vector<18x32xf32>
    %9 = arith.mulf %8, %8 : vector<18x32xf32>
    %cst_6 = arith.constant dense<0.000000e+00> : vector<18xf32>
    %10 = vector.multi_reduction <add>, %9, %cst_6 [1] : vector<18x32xf32> to vector<18xf32>
    %11 = vector.shape_cast %10 : vector<18xf32> to vector<18x1xf32>
    %cst_7 = arith.constant 3.200000e+01 : f32
    %12 = vector.broadcast %cst_7 : f32 to vector<18x1xf32>
    %13 = arith.divf %11, %12 : vector<18x1xf32>
    %14 = vector.broadcast %6 : vector<18x1xf32> to vector<18x32xf32>
    %15 = arith.subf %0, %14 : vector<18x32xf32>
    %cst_8 = arith.constant 9.99999997E-7 : f32
    %16 = vector.broadcast %cst_8 : f32 to vector<18x1xf32>
    %17 = arith.addf %13, %16 : vector<18x1xf32>
    %18 = math.rsqrt %17 : vector<18x1xf32>
    %19 = vector.broadcast %18 : vector<18x1xf32> to vector<18x32xf32>
    %20 = arith.mulf %15, %19 : vector<18x32xf32>
    %21 = vector.broadcast %1 : vector<1x32xf32> to vector<18x32xf32>
    %22 = arith.mulf %20, %21 : vector<18x32xf32>
    %23 = vector.broadcast %2 : vector<1x32xf32> to vector<18x32xf32>
    %24 = arith.addf %22, %23 : vector<18x32xf32>
    %c0_9 = arith.constant 0 : index
    %c0_10 = arith.constant 0 : index
    %25 = vector.load %arg4[%c0_9, %c0_10] : memref<18x32xf32, #tpu.memory_space<vmem>>, vector<18x32xf32>
    tpu.vector_store %arg4[%c0_9, %c0_10], %24 {strides = array<i32>} : memref<18x32xf32, #tpu.memory_space<vmem>>, vector<18x32xf32>,
    return
  }
  func.func @transform_0(%arg0: i32) -> (i32, i32) {
    %c0_i32 = arith.constant 0 : i32
    %c0_i32_0 = arith.constant 0 : i32
    return %arg0, %c0_i32 : i32, i32
  }
  func.func @transform_1(%arg0: i32) -> (i32, i32) {
    %c0_i32 = arith.constant 0 : i32
    %c0_i32_0 = arith.constant 0 : i32
    %c0_i32_1 = arith.constant 0 : i32
    return %c0_i32, %c0_i32_0 : i32, i32
  }
  func.func @transform_2(%arg0: i32) -> (i32, i32) {
    %c0_i32 = arith.constant 0 : i32
    %c0_i32_0 = arith.constant 0 : i32
    %c0_i32_1 = arith.constant 0 : i32
    return %c0_i32, %c0_i32_0 : i32, i32
  }
  func.func @transform_3(%arg0: i32) -> (i32, i32) {
    %c0_i32 = arith.constant 0 : i32
    %c0_i32_0 = arith.constant 0 : i32
    return %arg0, %c0_i32 : i32, i32
  }
}

module attributes {stable_mosaic.version = 11 : i64} {
  func.func @_ln_mlp_residual_kernel(%arg0: i32, %arg1: memref<18x32xf32, #tpu.memory_space<vmem>>, %arg2: memref<1x32xf32, #tpu.memory_space<vmem>>, %arg3: memref<1x32xf32, #tpu.memory_space<vmem>>, %arg4: memref<32x128xbf16, #tpu.memory_space<vmem>>, %arg5: memref<1x128xf32, #tpu.memory_space<vmem>>, %arg6: memref<128x32xbf16, #tpu.memory_space<vmem>>, %arg7: memref<1x32xf32, #tpu.memory_space<vmem>>, %arg8: memref<1x32xf32, #tpu.memory_space<vmem>>, %arg9: memref<18x32xf32, #tpu.memory_space<vmem>>) attributes {dimension_semantics = [#tpu.dimension_semantics<parallel>], iteration_bounds = array<i64: 1>, scalar_prefetch = 0 : i64, scratch_operands = 0 : i64, tpu.core_type = #tpu.core_type<tc>, window_params = [{transform_indices = @transform_0, window_bounds = array<i64: 18, 32>}, {pipeline_mode = #tpu.pipeline_mode<synchronous>, transform_indices = @transform_1, window_bounds = array<i64: 1, 32>}, {pipeline_mode = #tpu.pipeline_mode<synchronous>, transform_indices = @transform_2, window_bounds = array<i64: 1, 32>}, {pipeline_mode = #tpu.pipeline_mode<synchronous>, transform_indices = @transform_3, window_bounds = array<i64: 32, 128>}, {pipeline_mode = #tpu.pipeline_mode<synchronous>, transform_indices = @transform_4, window_bounds = array<i64: 1, 128>}, {pipeline_mode = #tpu.pipeline_mode<synchronous>, transform_indices = @transform_5, window_bounds = array<i64: 128, 32>}, {pipeline_mode = #tpu.pipeline_mode<synchronous>, transform_indices = @transform_6, window_bounds = array<i64: 1, 32>}, {pipeline_mode = #tpu.pipeline_mode<synchronous>, transform_indices = @transform_7, window_bounds = array<i64: 1, 32>}, {transform_indices = @transform_8, window_bounds = array<i64: 18, 32>}]} {
    %c0 = arith.constant 0 : index
    %c0_0 = arith.constant 0 : index
    %0 = vector.load %arg1[%c0, %c0_0] : memref<18x32xf32, #tpu.memory_space<vmem>>, vector<18x32xf32>
    %c0_1 = arith.constant 0 : index
    %c0_2 = arith.constant 0 : index
    %1 = vector.load %arg2[%c0_1, %c0_2] : memref<1x32xf32, #tpu.memory_space<vmem>>, vector<1x32xf32>
    %c0_3 = arith.constant 0 : index
    %c0_4 = arith.constant 0 : index
    %2 = vector.load %arg3[%c0_3, %c0_4] : memref<1x32xf32, #tpu.memory_space<vmem>>, vector<1x32xf32>
    %cst = arith.constant dense<0.000000e+00> : vector<18xf32>
    %3 = vector.multi_reduction <add>, %0, %cst [1] : vector<18x32xf32> to vector<18xf32>
    %4 = vector.shape_cast %3 : vector<18xf32> to vector<18x1xf32>
    %cst_5 = arith.constant 3.200000e+01 : f32
    %5 = vector.broadcast %cst_5 : f32 to vector<18x1xf32>
    %6 = arith.divf %4, %5 : vector<18x1xf32>
    %7 = vector.broadcast %6 : vector<18x1xf32> to vector<18x32xf32>
    %8 = arith.subf %0, %7 : vector<18x32xf32>
    %9 = arith.mulf %8, %8 : vector<18x32xf32>
    %cst_6 = arith.constant dense<0.000000e+00> : vector<18xf32>
    %10 = vector.multi_reduction <add>, %9, %cst_6 [1] : vector<18x32xf32> to vector<18xf32>
    %11 = vector.shape_cast %10 : vector<18xf32> to vector<18x1xf32>
    %cst_7 = arith.constant 3.200000e+01 : f32
    %12 = vector.broadcast %cst_7 : f32 to vector<18x1xf32>
    %13 = arith.divf %11, %12 : vector<18x1xf32>
    %14 = vector.broadcast %6 : vector<18x1xf32> to vector<18x32xf32>
    %15 = arith.subf %0, %14 : vector<18x32xf32>
    %cst_8 = arith.constant 9.99999997E-7 : f32
    %16 = vector.broadcast %cst_8 : f32 to vector<18x1xf32>
    %17 = arith.addf %13, %16 : vector<18x1xf32>
    %18 = math.rsqrt %17 : vector<18x1xf32>
    %19 = vector.broadcast %18 : vector<18x1xf32> to vector<18x32xf32>
    %20 = arith.mulf %15, %19 : vector<18x32xf32>
    %21 = vector.broadcast %1 : vector<1x32xf32> to vector<18x32xf32>
    %22 = arith.mulf %20, %21 : vector<18x32xf32>
    %23 = vector.broadcast %2 : vector<1x32xf32> to vector<18x32xf32>
    %24 = arith.addf %22, %23 : vector<18x32xf32>
    %25 = arith.truncf %24 : vector<18x32xf32> to vector<18x32xbf16>
    %c0_9 = arith.constant 0 : index
    %c0_10 = arith.constant 0 : index
    %26 = vector.load %arg4[%c0_9, %c0_10] : memref<32x128xbf16, #tpu.memory_space<vmem>>, vector<32x128xbf16>
    %cst_11 = arith.constant dense<0.000000e+00> : vector<18x128xf32>
    %27 = tpu.matmul %25, %26, %cst_11 {dimension_numbers = #tpu.dot_dimension_numbers<[1], [0], [0], [1], [0, 0, 1, 1], [], []>} : vector<18x32xbf16>, vector<32x128xbf16>, vector<18x128xf32> -> vector<18x128xf32>
    %c0_12 = arith.constant 0 : index
    %c0_13 = arith.constant 0 : index
    %28 = vector.load %arg5[%c0_12, %c0_13] : memref<1x128xf32, #tpu.memory_space<vmem>>, vector<1x128xf32>
    %29 = vector.broadcast %28 : vector<1x128xf32> to vector<18x128xf32>
    %30 = arith.addf %27, %29 : vector<18x128xf32>
    %31 = arith.mulf %30, %30 : vector<18x128xf32>
    %32 = arith.mulf %30, %31 : vector<18x128xf32>
    %cst_14 = arith.constant 4.471500e-02 : f32
    %33 = vector.broadcast %cst_14 : f32 to vector<18x128xf32>
    %34 = arith.mulf %33, %32 : vector<18x128xf32>
    %35 = arith.addf %30, %34 : vector<18x128xf32>
    %cst_15 = arith.constant 0.797884583 : f32
    %36 = vector.broadcast %cst_15 : f32 to vector<18x128xf32>
    %37 = arith.mulf %36, %35 : vector<18x128xf32>
    %38 = math.tanh %37 : vector<18x128xf32>
    %cst_16 = arith.constant 1.000000e+00 : f32
    %39 = vector.broadcast %cst_16 : f32 to vector<18x128xf32>
    %40 = arith.addf %39, %38 : vector<18x128xf32>
    %cst_17 = arith.constant 5.000000e-01 : f32
    %41 = vector.broadcast %cst_17 : f32 to vector<18x128xf32>
    %42 = arith.mulf %41, %40 : vector<18x128xf32>
    %43 = arith.mulf %30, %42 : vector<18x128xf32>
    %44 = arith.truncf %43 : vector<18x128xf32> to vector<18x128xbf16>
    %c0_18 = arith.constant 0 : index
    %c0_19 = arith.constant 0 : index
    %45 = vector.load %arg6[%c0_18, %c0_19] : memref<128x32xbf16, #tpu.memory_space<vmem>>, vector<128x32xbf16>
    %cst_20 = arith.constant dense<0.000000e+00> : vector<18x32xf32>
    %46 = tpu.matmul %44, %45, %cst_20 {dimension_numbers = #tpu.dot_dimension_numbers<[1], [0], [0], [1], [0, 0, 1, 1], [], []>} : vector<18x128xbf16>, vector<128x32xbf16>, vector<18x32xf32> -> vector<18x32xf32>
    %c0_21 = arith.constant 0 : index
    %c0_22 = arith.constant 0 : index
    %47 = vector.load %arg7[%c0_21, %c0_22] : memref<1x32xf32, #tpu.memory_space<vmem>>, vector<1x32xf32>
    %48 = vector.broadcast %47 : vector<1x32xf32> to vector<18x32xf32>
    %49 = arith.addf %46, %48 : vector<18x32xf32>
    %c0_23 = arith.constant 0 : index
    %c0_24 = arith.constant 0 : index
    %50 = vector.load %arg8[%c0_23, %c0_24] : memref<1x32xf32, #tpu.memory_space<vmem>>, vector<1x32xf32>
    %51 = vector.broadcast %50 : vector<1x32xf32> to vector<18x32xf32>
    %52 = arith.mulf %51, %49 : vector<18x32xf32>
    %53 = arith.addf %0, %52 : vector<18x32xf32>
    %c0_25 = arith.constant 0 : index
    %c0_26 = arith.constant 0 : index
    %54 = vector.load %arg9[%c0_25, %c0_26] : memref<18x32xf32, #tpu.memory_space<vmem>>, vector<18x32xf32>
    tpu.vector_store %arg9[%c0_25, %c0_26], %53 {strides = array<i32>} : memref<18x32xf32, #tpu.memory_space<vmem>>, vector<18x32xf32>,
    return
  }
  func.func @transform_0(%arg0: i32) -> (i32, i32) {
    %c0_i32 = arith.constant 0 : i32
    %c0_i32_0 = arith.constant 0 : i32
    return %arg0, %c0_i32 : i32, i32
  }
  func.func @transform_1(%arg0: i32) -> (i32, i32) {
    %c0_i32 = arith.constant 0 : i32
    %c0_i32_0 = arith.constant 0 : i32
    %c0_i32_1 = arith.constant 0 : i32
    return %c0_i32, %c0_i32_0 : i32, i32
  }
  func.func @transform_2(%arg0: i32) -> (i32, i32) {
    %c0_i32 = arith.constant 0 : i32
    %c0_i32_0 = arith.constant 0 : i32
    %c0_i32_1 = arith.constant 0 : i32
    return %c0_i32, %c0_i32_0 : i32, i32
  }
  func.func @transform_3(%arg0: i32) -> (i32, i32) {
    %c0_i32 = arith.constant 0 : i32
    %c0_i32_0 = arith.constant 0 : i32
    %c0_i32_1 = arith.constant 0 : i32
    return %c0_i32, %c0_i32_0 : i32, i32
  }
  func.func @transform_4(%arg0: i32) -> (i32, i32) {
    %c0_i32 = arith.constant 0 : i32
    %c0_i32_0 = arith.constant 0 : i32
    %c0_i32_1 = arith.constant 0 : i32
    return %c0_i32, %c0_i32_0 : i32, i32
  }
  func.func @transform_5(%arg0: i32) -> (i32, i32) {
    %c0_i32 = arith.constant 0 : i32
    %c0_i32_0 = arith.constant 0 : i32
    %c0_i32_1 = arith.constant 0 : i32
    return %c0_i32, %c0_i32_0 : i32, i32
  }
  func.func @transform_6(%arg0: i32) -> (i32, i32) {
    %c0_i32 = arith.constant 0 : i32
    %c0_i32_0 = arith.constant 0 : i32
    %c0_i32_1 = arith.constant 0 : i32
    return %c0_i32, %c0_i32_0 : i32, i32
  }
  func.func @transform_7(%arg0: i32) -> (i32, i32) {
    %c0_i32 = arith.constant 0 : i32
    %c0_i32_0 = arith.constant 0 : i32
    %c0_i32_1 = arith.constant 0 : i32
    return %c0_i32, %c0_i32_0 : i32, i32
  }
  func.func @transform_8(%arg0: i32) -> (i32, i32) {
    %c0_i32 = arith.constant 0 : i32
    %c0_i32_0 = arith.constant 0 : i32
    return %arg0, %c0_i32 : i32, i32
  }
}

</mosaic_0001>

<bundles_post_ra>
// kernel: dinov2_forward.21
= control target key start
LH: loop header
LB: loop body
LE: loop exit
PB: predicated region body
PF: predicated region fallthrough
CT: control target
= control target key end

     0   :  { %s786_s12 = smov 0   ;;  %s788_s13 = smov 0   ;;  %s862_s0 = inlined_call_operand.vmem [shape: f32[2,9,32], index: 0, kind: input, shape index: {}]   ;;  %s863_s1 = inlined_call_operand.vmem [shape: f32[2,9,32], index: 1, kind: input, shape index: {}]   ;;  %s864_s2 = inlined_call_operand.vmem [shape: f32[2,9,32], index: 2, kind: input, shape index: {}]   ;;  %s865_s3 = inlined_call_operand.vmem [shape: f32[2,9,32], index: 3, kind: output, shape index: {}]  }
   0x1   :  { %s790_s14 = smov 0  }
   0x2 LB: > { %s25_s15 = sadd.s32 1, %s755_s13  ;;  %p641_p0 = scmp.ge.s32.totalorder %s759_s14, 1  ;;  %s759_s14 = sphi %s790_s14, %s13_s14   ;;  %s755_s13 = sphi %s788_s13, %s867_s13   ;;  %s751_s12 = sphi %s786_s12, %s866_s12  }
   0x3   : > { %p27_p1 = scmp.ge.s32.totalorder %s25_s15, 2  ;;  %p178_p2 = scmp.lt.s32.totalorder %s759_s14, 3 }
   0x5   : > { %s869_s15 = smov (%p27_p1, %s25_s15), 0  ;;  %p179_p3 = pnand %p641_p0, %p178_p2 }
   0x6   : > { %p221_p4 = scmp.lt.s32.totalorder (!%p179_p3), %s751_s12, 1  ;;  %s763_s23 = smov (!%p179_p3), 112  }
   0x7   : > { %182 = sbr.rel (%p179_p3) target bundleno = 1062 (0x426), region = 32  ;;  %s765_s27 = smov (!%p179_p3), 16  }
   0xc   : > { %v761_v0 = vmov 0.0   ;;  %vm762_vm0 = vmmov 0   ;;  %s871_s12 = smov (!%p221_p4, %s751_s12), 1  ;;  %vm262_vm1 = vcmask 130048   ;;  %vm310_vm2 = vcmask 72704  }
   0xd   : > { %668 = vmatprep.subr.bf16.mxu0 %v761_v0  ;;  %670 = vmatprep.mubr.msk.bf16.mxu0 %vm762_vm0, %v761_v0  ;;  %s810_s16 = sshll.u32 %s871_s12, 4  ;;  %vm314_vm3 = vcmask 65536   ;;  %vm334_vm4 = vcmask 1043456   ;;  %vm335_vm5 = vcmask 1044480   ;;  %v764_v18 = vmov 65535  }
   0xe   : > { %674 = vmatprep.subr.bf16.mxu1 %v761_v0  ;;  %676 = vmatprep.mubr.msk.bf16.mxu1 %vm762_vm0, %v761_v0  ;;  %s234_s19 = scalar_lea.vmem %s863_s1, %s810_s16  ;;  %s228_s22 = scalar_lea.vmem %s862_s0, %s810_s16  ;;  %v336_v19 = vsel %vm334_vm4, 4294967295, %v764_v18  ;;  %vm522_vm6 = vcmask 261120   ;;  %vm524_vm7 = vcmask 253952  }
   0xf   : > { %v253_v1 = vld [vmem:[%s234_s19] sm:$0xff]  ;;  %v254_v2 = vld [vmem:[%s234_s19 + $0x8] sm:$0x1]  ;;  %s239_s26 = scalar_lea.vmem %s864_s2, %s810_s16  ;;  %v337_v21 = vsel %vm335_vm5, %v336_v19, 0  ;;  %s248_s30 = scalar_lea.vmem %s865_s3, %s810_s16 }
  0x10   : > { %v251_v3 = vld [vmem:[%s228_s22] sm:$0xff]  ;;  %v255_v4 = vpack.c.bf16 %v254_v2, %v253_v1  ;;  %v252_v5 = vld [vmem:[%s228_s22 + $0x8] sm:$0x1] }
  0x11   : > { %v259_v7 = vmul.f32 0.25, %v251_v3  ;;  %v260_v8 = vmul.f32 0.25, %v252_v5  ;;  %v256_v16 = vld [vmem:[%s239_s26] sm:$0xff]  ;;  %v257_v17 = vld [vmem:[%s239_s26 + $0x8] sm:$0x1] }
  0x12   : > { %v267_v6 = vsel %vm262_vm1, %v255_v4, 0  ;;  %390 = vrot.lane.b32.xlu1 %v255_v4, %s763_s23  ;;  %v258_v20 = vpack.c.bf16 %v257_v17, %v256_v16 }
  0x13   : > { %669 = vmatpush3.bf16.xpose.msra.mxu0 %v267_v6  ;;  %v261_v9 = vpack.c.bf16 %v260_v8, %v259_v7 }
  0x14   : > { %686 = vmatprep.subr.bf16.mxu0 %v761_v0  ;;  %v339_v22 = vand.u32 %v337_v21, %v258_v20 }
  0x16   : > { %387 = vrot.lane.b32.xlu1 %v261_v9, %s763_s23  ;;  %675 = vmatpush3.bf16.msra.mxu1 %v339_v22 }
  0x17   : > { %680 = vmatprep.subr.bf16.mxu1 %v761_v0 }
  0x1a   : > { %671 = vmatmul.mubr.msk.bf16.vlgmr.msra.gmra.mxu0 %vm262_vm1, %v261_v9 }
  0x1b   : > { %688 = vmatprep.mubr.msk.bf16.mxu0 %vm762_vm0, %v761_v0 }
  0x84   : > { %v391_v29 = vpop.permute.xlu1 %390 }
  0x85   : > { %v396_v32 = vsel %vm262_vm1, %v391_v29, 0 }
  0x88   : > { %v388_v34 = vpop.permute.xlu1 %387 }
  0xda   : > { %v303_v10 = vpop.f32.mrf.mxu0 }
  0xdb   : > { %v311_v11 = vsel %vm310_vm2, %v303_v10, -inf }
  0xdc   : > { %312 = vmax.xlane.f32.xlu0 %v311_v11  ;;  %v672_v12 = vpop.f32.mrf.mxu0 }
  0xde   : > { %v306_v13 = vpop.f32.mrf.mxu0 }
  0xdf   : > { %v315_v14 = vsel %vm314_vm3, %v306_v13, -inf }
  0xe0   : > { %316 = vmax.xlane.f32.xlu0 %v315_v14  ;;  %v673_v15 = vpop.f32.mrf.mxu0 }
 0x165   : > { %v313_v23 = vpop.xlane.xlu0 %312 }
 0x166   : > { %v318_v24 = vsub.f32 %v303_v10, %v313_v23 }
 0x168   : > { %v320_v25 = vmul.f32 1.442695, %v318_v24 }
 0x169   : > { %v317_v26 = vpop.xlane.xlu0 %316 }
 0x16a   : > { %v319_v27 = vsub.f32 %v306_v13, %v317_v26  ;;  %721 = vpow2.f32 %v320_v25 }
 0x16c   : > { %v322_v28 = vmul.f32 1.442695, %v319_v27 }
 0x16e   : > { %723 = vpow2.f32 %v322_v28 }
 0x177   : > { %v722_v30 = vpop.eup %721 }
 0x178   : > { %v324_v58 = vsel %vm310_vm2, %v722_v30, 0.0 }
 0x17b   : > { %v724_v31 = vpop.eup %723 }
 0x17c   : > { %v330_v33 = vpack.c.bf16 %v724_v31, %v722_v30  ;;  %v327_v59 = vsel %vm314_vm3, %v724_v31, 0.0 }
 0x17e   : > { %677 = vmatmul.mubr.msk.bf16.vlgmr.msra.gmra.mxu1 %vm310_vm2, %v330_v33 }
 0x17f   : > { %681 = vmatpush3.bf16.xpose.msra.mxu1 %v396_v32  ;;  %682 = vmatprep.mubr.msk.bf16.mxu1 %vm762_vm0, %v761_v0 }
 0x186   : > { %683 = vmatmul.mubr.msk.bf16.vlgmr.msra.gmra.mxu1 %vm262_vm1, %v388_v34 }
 0x23e   : > { %v375_v35 = vpop.f32.mrf.mxu1 }
 0x240   : > { %v678_v36 = vpop.f32.mrf.mxu1 }
 0x242   : > { %v378_v37 = vpop.f32.mrf.mxu1 }
 0x244   : > { %v679_v38 = vpop.f32.mrf.mxu1 }
 0x246   : > { %v432_v39 = vpop.f32.mrf.mxu1 }
 0x247   : > { %v439_v40 = vsel %vm310_vm2, %v432_v39, -inf }
 0x248   : > { %440 = vmax.xlane.f32.xlu0 %v439_v40  ;;  %v684_v41 = vpop.f32.mrf.mxu1 }
 0x24a   : > { %v435_v42 = vpop.f32.mrf.mxu1 }
 0x24b   : > { %v442_v43 = vsel %vm314_vm3, %v435_v42, -inf }
 0x24c   : > { %443 = vmax.xlane.f32.xlu1 %v442_v43  ;;  %v685_v44 = vpop.f32.mrf.mxu1 }
 0x25e   : > { %459 = vrot.lane.b32.xlu0 %v258_v20, %s763_s23 }
 0x2d1   : > { %v441_v45 = vpop.xlane.xlu0 %440 }
 0x2d2   : > { %v445_v46 = vsub.f32 %v432_v39, %v441_v45 }
 0x2d4   : > { %v447_v47 = vmul.f32 1.442695, %v445_v46 }
 0x2d5   : > { %v444_v48 = vpop.xlane.xlu1 %443  ;;  %v460_v49 = vpop.permute.xlu0 %459 }
 0x2d6   : > { %725 = vpow2.f32 %v447_v47  ;;  %v446_v50 = vsub.f32 %v435_v42, %v444_v48  ;;  %v465_v51 = vand.u32 %v460_v49, %v337_v21 }
 0x2d8   : > { %v449_v52 = vmul.f32 1.442695, %v446_v50  ;;  %687 = vmatpush3.bf16.msra.mxu0 %v465_v51 }
 0x2da   : > { %727 = vpow2.f32 %v449_v52 }
 0x2e3   : > { %v726_v53 = vpop.eup %725 }
 0x2e4   : > { %v451_v54 = vsel %vm310_vm2, %v726_v53, 0.0 }
 0x2e5   : > { %452 = vadd.xlane.f32.xlu0 %v451_v54 }
 0x2e7   : > { %v728_v55 = vpop.eup %727 }
 0x2e8   : > { %v454_v56 = vsel %vm314_vm3, %v728_v55, 0.0  ;;  %v457_v57 = vpack.c.bf16 %v728_v55, %v726_v53 }
 0x2e9   : > { %455 = vadd.xlane.f32.xlu1 %v454_v56 }
 0x2ea   : > { %689 = vmatmul.mubr.msk.bf16.vlgmr.msra.gmra.mxu0 %vm310_vm2, %v457_v57 }
 0x2ed   : > { %325 = vadd.xlane.f32.xlu1 %v324_v58 }
 0x2f1   : > { %328 = vadd.xlane.f32.xlu1 %v327_v59 }
 0x36e   : > { %v453_v60 = vpop.xlane.xlu0 %452 }
 0x36f   : > { %729 = vrcp.f32 %v453_v60 }
 0x372   : > { %v456_v61 = vpop.xlane.xlu1 %455 }
 0x373   : > { %731 = vrcp.f32 %v456_v61 }
 0x376   : > { %v326_v6 = vpop.xlane.xlu1 %325 }
 0x377   : > { %733 = vrcp.f32 %v326_v6 }
 0x37a   : > { %v329_v7 = vpop.xlane.xlu1 %328 }
 0x37b   : > { %735 = vrcp.f32 %v329_v7 }
 0x37c   : > { %v730_v62 = vpop.eup %729 }
 0x380   : > { %v732_v2 = vpop.eup %731 }
 0x384   : > { %v734_v8 = vpop.eup %733 }
 0x385   : > { %v384_v9 = vmul.f32 %v734_v8, %v375_v35 }
 0x388   : > { %v736_v10 = vpop.eup %735 }
 0x389   : > { %v385_v13 = vmul.f32 %v736_v10, %v378_v37 }
 0x3aa   : > { %v501_v63 = vpop.f32.mrf.mxu0 }
 0x3ab   : > { %v510_v0 = vmul.f32 %v730_v62, %v501_v63 }
 0x3ac   : > { %v690_v1 = vpop.f32.mrf.mxu0 }
 0x3ad   : > { %514 = vrot.lane.b32.xlu1 %v510_v0, %s765_s27 }
 0x3ae   : > { %v504_v3 = vpop.f32.mrf.mxu0 }
 0x3af   : > { %v511_v4 = vmul.f32 %v732_v2, %v504_v3 }
 0x3b0   : > { %v691_v5 = vpop.f32.mrf.mxu0 }
 0x3b1   : > { %516 = vrot.lane.b32.xlu0 %v511_v4, %s765_s27 }
 0x41f   : > { %v515_v11 = vpop.permute.xlu1 %514 }
 0x420   : > { %v520_v12 = vsel %vm262_vm1, %v384_v9, %v515_v11 }
 0x421   : > { %523 = vst.msk [vmem:[%s248_s30] sm:$0xff] %vm522_vm6, %v520_v12 }
 0x423   : > { %v517_v14 = vpop.permute.xlu0 %516 }
 0x424   : > { %v521_v15 = vsel %vm262_vm1, %v385_v13, %v517_v14 }
 0x425   : > { %525 = vst.msk [vmem:[%s248_s30 + $0x8] sm:$0x1] %vm524_vm7, %v521_v15 }
 0x426 PF: > { %s13_s14 = sadd.s32 1, %s759_s14   ;;  %s866_s12 = smov %s755_s13 }
 0x427   : > { %p10_p5 = scmp.ge.s32.totalorder %s13_s14, 4   ;;  %s867_s13 = smov %s869_s15 }
 0x429   :  { %12 = sbr.rel (!%p10_p5) target bundleno = 2 (0x2), region = 68 }

// kernel: dinov2_forward.22
= control target key start
LH: loop header
LB: loop body
LE: loop exit
PB: predicated region body
PF: predicated region fallthrough
CT: control target
= control target key end

     0   :  { %vm49_vm0 = vcmask 261120   ;;  %vm122_vm1 = vcmask 254976   ;;  %s221_s1 = inlined_call_operand.vmem [shape: bf16[32,32], index: 1, kind: input, shape index: {}]   ;;  %s222_s0 = inlined_call_operand.vmem [shape: f32[18,32], index: 0, kind: input, shape index: {}]   ;;  %s223_s2 = inlined_call_operand.vmem [shape: f32[1,32], index: 2, kind: input, shape index: {}]   ;;  %s224_s3 = inlined_call_operand.vmem [shape: f32[1,32], index: 3, kind: input, shape index: {}]   ;;  %s225_s4 = inlined_call_operand.vmem [shape: f32[18,32], index: 4, kind: input, shape index: {}, may-alias: {4,5}]   ;;  %s226_s5 = inlined_call_operand.vmem [shape: f32[18,32], index: 5, kind: output, shape index: {}, may-alias: {4,5}]  }
   0x1   :  { %v146_v0 = vld [vmem:[%s221_s1 + $0x8] sm:$0xff]   ;;  %v147_v1 = vld [vmem:[%s221_s1] sm:$0xff]   ;;  %v23_v4 = vld [vmem:[%s222_s0 + $0x10] sm:$0x3] }
   0x2   :  { %138 = vmatprep.subr.bf16.mxu0 %v146_v0  ;;  %v21_v2 = vld [vmem:[%s222_s0] sm:$0xff]  ;;  %v22_v3 = vld [vmem:[%s222_s0 + $0x8] sm:$0xff]  ;;  %v25_v6 = vpack.c.bf16 %v23_v4, %v23_v4  ;;  %v106_v11 = vld [vmem:[%s225_s4 + $0x10] sm:$0x3] }
   0x3   :  { %139 = vmatpush3.bf16.msra.mxu0 %v146_v0  ;;  %v24_v5 = vpack.c.bf16 %v22_v3, %v21_v2  ;;  %v128_v7 = vld [vmem:[%s223_s2] ss:$0 sm:$0xff] }
   0x4   :  { %140 = vmatprep.subr.bf16.mxu0 %v147_v1  ;;  %v133_v9 = vld [vmem:[%s224_s3] ss:$0 sm:$0xff] }
   0x5   :  { %142 = vmatprep.mubr.msk.bf16.mxu0 %vm49_vm0, %v24_v5  ;;  %v104_v15 = vld [vmem:[%s225_s4] sm:$0xff] }
   0x7   :  { %141 = vmatpush3.bf16.msra.mxu0 %v147_v1 }
   0xa   :  { %143 = vmatmul.mubr.msk.bf16.vlgmr.msra.gmra.mxu0 %vm49_vm0, %v25_v6 }
  0xca   :  { %v144_v8 = vpop.f32.mrf.mxu0 }
  0xcb   :  { %v99_v10 = vadd.f32 %v144_v8, %v128_v7 }
  0xcc   :  { %v90_v12 = vpop.f32.mrf.mxu0 }
  0xcd   :  { %v116_v13 = vmul.f32 %v133_v9, %v99_v10  ;;  %v91_v14 = vadd.f32 %v128_v7, %v90_v12 }
  0xce   :  { %v145_v16 = vpop.f32.mrf.mxu0 }
  0xcf   :  { %v119_v17 = vadd.f32 %v116_v13, %v106_v11  ;;  %v114_v18 = vmul.f32 %v133_v9, %v91_v14 }
  0xd0   :  { %v93_v19 = vpop.f32.mrf.mxu0 }
  0xd1   :  { %123 = vst.msk [vmem:[%s226_s5 + $0x10] sm:$0x3] %vm122_vm1, %v119_v17  ;;  %v117_v20 = vadd.f32 %v114_v18, %v104_v15  ;;  %v94_v21 = vadd.f32 %v128_v7, %v93_v19 }
  0xd3   :  { %v115_v23 = vmul.f32 %v133_v9, %v94_v21 }
  0xd8   :  { %v105_v22 = vld [vmem:[%s225_s4 + $0x8] sm:$0xff] }
  0xd9   :  { %120 = vst.msk [vmem:[%s226_s5] sm:$0xff] %vm49_vm0, %v117_v20  ;;  %v118_v24 = vadd.f32 %v115_v23, %v105_v22 }
  0xdb   :  { %121 = vst.msk [vmem:[%s226_s5 + $0x8] sm:$0xff] %vm49_vm0, %v118_v24 }

// kernel: dinov2_forward.20
= control target key start
LH: loop header
LB: loop body
LE: loop exit
PB: predicated region body
PF: predicated region fallthrough
CT: control target
= control target key end

     0   :  { %vm41_vm0 = vcmask 261120   ;;  %vm48_vm1 = vcmask 254976   ;;  %s558_s0 = inlined_call_operand.vmem [shape: f32[18,32], index: 0, kind: input, shape index: {}]   ;;  %s559_s3 = inlined_call_operand.vmem [shape: bf16[32,32], index: 3, kind: input, shape index: {}]   ;;  %s560_s5 = inlined_call_operand.vmem [shape: bf16[32,32], index: 5, kind: input, shape index: {}]   ;;  %s561_s7 = inlined_call_operand.vmem [shape: bf16[32,32], index: 7, kind: input, shape index: {}]   ;;  %s562_s1 = inlined_call_operand.vmem [shape: f32[1,32], index: 1, kind: input, shape index: {}]   ;;  %s563_s2 = inlined_call_operand.vmem [shape: f32[1,32], index: 2, kind: input, shape index: {}]   ;;  %s564_s4 = inlined_call_operand.vmem [shape: f32[1,32], index: 4, kind: input, shape index: {}]   ;;  %s565_s6 = inlined_call_operand.vmem [shape: f32[1,32], index: 6, kind: input, shape index: {}]   ;;  %s566_s9 = inlined_call_operand.vmem [shape: f32[18,32], index: 9, kind: output, shape index: {0}]   ;;  %s567_s10 = inlined_call_operand.vmem [shape: f32[18,32], index: 10, kind: output, shape index: {1}]   ;;  %s568_s8 = inlined_call_operand.vmem [shape: f32[1,32], index: 8, kind: input, shape index: {}]   ;;  %s569_s11 = inlined_call_operand.vmem [shape: f32[18,32], index: 11, kind: output, shape index: {2}]  }
   0x1   :  { %v36_v0 = vld [vmem:[%s558_s0] sm:$0xff]  ;;  %v38_v1 = vld [vmem:[%s558_s0 + $0x10] sm:$0x3]  ;;  %v37_v2 = vld [vmem:[%s558_s0 + $0x8] sm:$0xff] }
   0x2   :  { %v42_v3 = vsel %vm41_vm0, %v36_v0, 0.0  ;;  %v49_v4 = vsel %vm48_vm1, %v38_v1, 0.0  ;;  %v45_v5 = vsel %vm41_vm0, %v37_v2, 0.0  ;;  %v396_v21 = vld [vmem:[%s559_s3 + $0x8] sm:$0xff]   ;;  %v398_v23 = vld [vmem:[%s559_s3] sm:$0xff]  }
   0x3   :  { %43 = vadd.xlane.f32.xlu0 %v42_v3  ;;  %50 = vadd.xlane.f32.xlu1 %v49_v4  ;;  %v397_v22 = vld [vmem:[%s560_s5 + $0x8] sm:$0xff]   ;;  %v399_v24 = vld [vmem:[%s560_s5] sm:$0xff]  }
   0x4   :  { %372 = vmatprep.subr.bf16.mxu0 %v396_v21  ;;  %380 = vmatprep.subr.bf16.mxu1 %v397_v22  ;;  %v400_v25 = vld [vmem:[%s561_s7 + $0x8] sm:$0xff]   ;;  %v343_v37 = vld [vmem:[%s562_s1] ss:$0 sm:$0xff] }
   0x5   :  { %373 = vmatpush3.bf16.msra.mxu0 %v396_v21  ;;  %381 = vmatpush3.bf16.msra.mxu1 %v397_v22  ;;  %v344_v43 = vld [vmem:[%s563_s2] ss:$0 sm:$0xff] }
   0x6   :  { %374 = vmatprep.subr.bf16.mxu0 %v398_v23  ;;  %382 = vmatprep.subr.bf16.mxu1 %v399_v24  ;;  %v401_v51 = vld [vmem:[%s561_s7] sm:$0xff]  }
   0x7   :  { %46 = vadd.xlane.f32.xlu0 %v45_v5  ;;  %v345_v52 = vld [vmem:[%s564_s4] ss:$0 sm:$0xff] }
   0x8   :  { %v350_v53 = vld [vmem:[%s565_s6] ss:$0 sm:$0xff] }
   0x9   :  { %375 = vmatpush3.bf16.msra.mxu0 %v398_v23  ;;  %383 = vmatpush3.bf16.msra.mxu1 %v399_v24 }
   0xa   :  { %388 = vmatprep.subr.bf16.mxu0 %v400_v25 }
  0x8c   :  { %v44_v6 = vpop.xlane.xlu0 %43  ;;  %v51_v7 = vpop.xlane.xlu1 %50 }
  0x8d   :  { %v53_v8 = vmul.f32 0.03125, %v44_v6  ;;  %v55_v9 = vmul.f32 0.03125, %v51_v7 }
  0x8f   :  { %v56_v10 = vsub.f32 %v36_v0, %v53_v8  ;;  %v58_v11 = vsub.f32 %v38_v1, %v55_v9 }
  0x90   :  { %v47_v12 = vpop.xlane.xlu0 %46 }
  0x91   :  { %v54_v13 = vmul.f32 0.03125, %v47_v12  ;;  %v59_v14 = vmul.f32 %v56_v10, %v56_v10  ;;  %v61_v15 = vmul.f32 %v58_v11, %v58_v11 }
  0x93   :  { %v57_v16 = vsub.f32 %v37_v2, %v54_v13  ;;  %v62_v17 = vsel %vm41_vm0, %v59_v14, 0.0  ;;  %v68_v18 = vsel %vm48_vm1, %v61_v15, 0.0  ;;  %v355_v2 = vld [vmem:[%s568_s8] ss:$0 sm:$0xff] }
  0x94   :  { %63 = vadd.xlane.f32.xlu1 %v62_v17 }
  0x95   :  { %v60_v19 = vmul.f32 %v57_v16, %v57_v16 }
  0x97   :  { %v65_v20 = vsel %vm41_vm0, %v60_v19, 0.0 }
  0x98   :  { %69 = vadd.xlane.f32.xlu1 %v68_v18  ;;  %66 = vadd.xlane.f32.xlu0 %v65_v20 }
 0x11d   :  { %v64_v26 = vpop.xlane.xlu1 %63 }
 0x11e   :  { %v71_v27 = vmul.f32 0.03125, %v64_v26 }
 0x120   :  { %v74_v28 = vadd.f32 1e-06, %v71_v27 }
 0x121   :  { %v70_v29 = vpop.xlane.xlu1 %69  ;;  %v67_v30 = vpop.xlane.xlu0 %66 }
 0x122   :  { %402 = vrsqrt.f32 %v74_v28  ;;  %v73_v31 = vmul.f32 0.03125, %v70_v29  ;;  %v72_v32 = vmul.f32 0.03125, %v67_v30 }
 0x124   :  { %v76_v33 = vadd.f32 1e-06, %v73_v31  ;;  %v75_v34 = vadd.f32 1e-06, %v72_v32 }
 0x126   :  { %404 = vrsqrt.f32 %v76_v33 }
 0x127   :  { %406 = vrsqrt.f32 %v75_v34 }
 0x12f   :  { %v403_v35 = vpop.eup %402 }
 0x130   :  { %v80_v36 = vmul.f32 %v403_v35, %v56_v10 }
 0x132   :  { %v89_v42 = vmul.f32 %v343_v37, %v80_v36 }
 0x133   :  { %v405_v38 = vpop.eup %404 }
 0x134   :  { %v407_v39 = vpop.eup %406  ;;  %v82_v40 = vmul.f32 %v405_v38, %v58_v11  ;;  %v98_v47 = vadd.f32 %v344_v43, %v89_v42 }
 0x135   :  { %v81_v41 = vmul.f32 %v407_v39, %v57_v16 }
 0x136   :  { %v91_v44 = vmul.f32 %v343_v37, %v82_v40 }
 0x137   :  { %v90_v45 = vmul.f32 %v343_v37, %v81_v41 }
 0x138   :  { %v100_v46 = vadd.f32 %v344_v43, %v91_v44 }
 0x139   :  { %v99_v48 = vadd.f32 %v344_v43, %v90_v45 }
 0x13a   :  { %v102_v49 = vpack.c.bf16 %v100_v46, %v100_v46 }
 0x13b   :  { %v101_v50 = vpack.c.bf16 %v99_v48, %v98_v47 }
 0x13d   :  { %376 = vmatprep.mubr.msk.bf16.mxu0 %vm41_vm0, %v101_v50  ;;  %384 = vmatprep.mubr.msk.bf16.mxu1 %vm41_vm0, %v101_v50 }
 0x13e   :  { %377 = vmatmul.mubr.msk.bf16.vlgmr.msra.gmra.mxu0 %vm41_vm0, %v102_v49  ;;  %385 = vmatmul.mubr.msk.bf16.vlgmr.msra.gmra.mxu1 %vm41_vm0, %v102_v49 }
 0x13f   :  { %389 = vmatpush3.bf16.msra.mxu0 %v400_v25  ;;  %392 = vmatprep.mubr.msk.bf16.mxu0 %vm41_vm0, %v101_v50 }
 0x140   :  { %390 = vmatprep.subr.bf16.mxu0 %v401_v51 }
 0x143   :  { %391 = vmatpush3.bf16.msra.mxu0 %v401_v51 }
 0x146   :  { %393 = vmatmul.mubr.msk.bf16.vlgmr.msra.gmra.mxu0 %vm41_vm0, %v102_v49 }
 0x1fe   :  { %v378_v54 = vpop.f32.mrf.mxu0  ;;  %v386_v55 = vpop.f32.mrf.mxu1 }
 0x1ff   :  { %v175_v56 = vadd.f32 %v378_v54, %v345_v52  ;;  %v249_v57 = vadd.f32 %v386_v55, %v350_v53 }
 0x200   :  { %v166_v58 = vpop.f32.mrf.mxu0  ;;  %v240_v59 = vpop.f32.mrf.mxu1 }
 0x201   :  { %182 = vst.msk [vmem:[%s566_s9 + $0x10] sm:$0x3] %vm48_vm1, %v175_v56  ;;  %256 = vst.msk [vmem:[%s567_s10 + $0x10] sm:$0x3] %vm48_vm1, %v249_v57  ;;  %v167_v60 = vadd.f32 %v345_v52, %v166_v58  ;;  %v241_v61 = vadd.f32 %v350_v53, %v240_v59 }
 0x202   :  { %v379_v62 = vpop.f32.mrf.mxu0  ;;  %v387_v63 = vpop.f32.mrf.mxu1 }
 0x203   :  { %180 = vst.msk [vmem:[%s566_s9] sm:$0xff] %vm41_vm0, %v167_v60  ;;  %254 = vst.msk [vmem:[%s567_s10] sm:$0xff] %vm41_vm0, %v241_v61 }
 0x204   :  { %v169_v0 = vpop.f32.mrf.mxu0  ;;  %v243_v1 = vpop.f32.mrf.mxu1 }
 0x205   :  { %v170_v3 = vadd.f32 %v345_v52, %v169_v0  ;;  %v244_v4 = vadd.f32 %v350_v53, %v243_v1 }
 0x206   :  { %v394_v5 = vpop.f32.mrf.mxu0 }
 0x207   :  { %181 = vst.msk [vmem:[%s566_s9 + $0x8] sm:$0xff] %vm41_vm0, %v170_v3  ;;  %255 = vst.msk [vmem:[%s567_s10 + $0x8] sm:$0xff] %vm41_vm0, %v244_v4  ;;  %v323_v6 = vadd.f32 %v394_v5, %v355_v2 }
 0x208   :  { %v314_v7 = vpop.f32.mrf.mxu0 }
 0x209   :  { %330 = vst.msk [vmem:[%s569_s11 + $0x10] sm:$0x3] %vm48_vm1, %v323_v6  ;;  %v315_v8 = vadd.f32 %v355_v2, %v314_v7 }
 0x20a   :  { %v395_v9 = vpop.f32.mrf.mxu0 }
 0x20b   :  { %328 = vst.msk [vmem:[%s569_s11] sm:$0xff] %vm41_vm0, %v315_v8 }
 0x20c   :  { %v317_v10 = vpop.f32.mrf.mxu0 }
 0x20d   :  { %v318_v11 = vadd.f32 %v355_v2, %v317_v10 }
 0x20f   :  { %329 = vst.msk [vmem:[%s569_s11 + $0x8] sm:$0xff] %vm41_vm0, %v318_v11 }

// kernel: dinov2_forward.19
= control target key start
LH: loop header
LB: loop body
LE: loop exit
PB: predicated region body
PF: predicated region fallthrough
CT: control target
= control target key end

     0   :  { %v603_v35 = vmov 0.0   ;;  %vm331_vm0 = vcmask 1045504   ;;  %vm604_vm1 = vmmov 0   ;;  %vm327_vm2 = vcmask 621568   ;;  %s757_s1 = inlined_call_operand.vmem [shape: bf16[588,32], index: 1, kind: input, shape index: {}]   ;;  %s758_s0 = inlined_call_operand.vmem [shape: f32[8,588], index: 0, kind: input, shape index: {}]   ;;  %s759_s2 = inlined_call_operand.vmem [shape: f32[1,32], index: 2, kind: input, shape index: {}]   ;;  %s760_s3 = inlined_call_operand.vmem [shape: f32[8,32], index: 3, kind: output, shape index: {}]  }
   0x1   :  { %v566_v0 = vld [vmem:[%s757_s1 + $0x78] sm:$0xff]   ;;  %v570_v4 = vld [vmem:[%s757_s1 + $0x70] sm:$0xff]   ;;  %v574_v8 = vld [vmem:[%s757_s1 + $0x68] sm:$0xff]   ;;  %vm455_vm3 = vcmask 261120  }
   0x2   :  { %v567_v1 = vld [vmem:[%s757_s1 + $0x38] sm:$0xff]   ;;  %500 = vmatprep.subr.bf16.mxu0 %v566_v0  ;;  %v571_v5 = vld [vmem:[%s757_s1 + $0x30] sm:$0xff]   ;;  %v575_v9 = vld [vmem:[%s757_s1 + $0x28] sm:$0xff]  }
   0x3   :  { %v568_v2 = vld [vmem:[%s757_s1 + $0xf8] sm:$0xff]   ;;  %501 = vmatpush3.bf16.msra.mxu0 %v567_v1  ;;  %v572_v6 = vld [vmem:[%s757_s1 + $0xf0] sm:$0xff]   ;;  %v576_v10 = vld [vmem:[%s757_s1 + $0xe8] sm:$0xff]  }
   0x4   :  { %v569_v3 = vld [vmem:[%s757_s1 + $0xb8] sm:$0xff]   ;;  %522 = vmatprep.subr.bf16.mxu1 %v568_v2  ;;  %502 = vmatprep.subr.bf16.mxu0 %v570_v4  ;;  %v573_v7 = vld [vmem:[%s757_s1 + $0xb0] sm:$0xff]   ;;  %v577_v11 = vld [vmem:[%s757_s1 + $0xa8] sm:$0xff]  }
   0x5   :  { %523 = vmatpush3.bf16.msra.mxu1 %v569_v3  ;;  %v578_v12 = vld [vmem:[%s757_s1 + $0x60] sm:$0xff]   ;;  %v582_v16 = vld [vmem:[%s757_s1 + $0x58] sm:$0xff]   ;;  %v586_v20 = vld [vmem:[%s757_s1 + $0x50] sm:$0xff]  }
   0x6   :  { %524 = vmatprep.subr.bf16.mxu1 %v572_v6  ;;  %v579_v13 = vld [vmem:[%s757_s1 + $0x20] sm:$0xff]   ;;  %v583_v17 = vld [vmem:[%s757_s1 + $0x18] sm:$0xff]   ;;  %v587_v21 = vld [vmem:[%s757_s1 + $0x10] sm:$0xff]  }
   0x7   :  { %503 = vmatpush3.bf16.msra.mxu0 %v571_v5  ;;  %v580_v14 = vld [vmem:[%s757_s1 + $0xe0] sm:$0xff]   ;;  %v584_v18 = vld [vmem:[%s757_s1 + $0xd8] sm:$0xff]   ;;  %v588_v22 = vld [vmem:[%s757_s1 + $0xd0] sm:$0xff]  }
   0x8   :  { %504 = vmatprep.subr.bf16.mxu0 %v574_v8  ;;  %v581_v15 = vld [vmem:[%s757_s1 + $0xa0] sm:$0xff]   ;;  %v585_v19 = vld [vmem:[%s757_s1 + $0x98] sm:$0xff]   ;;  %v589_v23 = vld [vmem:[%s757_s1 + $0x90] sm:$0xff]  }
   0x9   :  { %525 = vmatpush3.bf16.msra.mxu1 %v573_v7  ;;  %v590_v24 = vld [vmem:[%s757_s1 + $0x48] sm:$0xff]   ;;  %v594_v28 = vld [vmem:[%s757_s1 + $0x40] sm:$0xff]   ;;  %v18_v36 = vld [vmem:[%s758_s0 + $0x18] sm:$0xff] }
   0xa   :  { %526 = vmatprep.subr.bf16.mxu1 %v576_v10  ;;  %v591_v25 = vld [vmem:[%s757_s1 + $0x8] sm:$0xff]   ;;  %v595_v29 = vld [vmem:[%s757_s1] sm:$0xff]   ;;  %v23_v38 = vpack.c.bf16 %v18_v36, %v18_v36  ;;  %v17_v40 = vld [vmem:[%s758_s0 + $0x10] sm:$0xff] }
   0xb   :  { %505 = vmatpush3.bf16.msra.mxu0 %v575_v9  ;;  %v592_v26 = vld [vmem:[%s757_s1 + $0xc8] sm:$0xff]   ;;  %v596_v30 = vld [vmem:[%s757_s1 + $0xc0] sm:$0xff]   ;;  %v22_v42 = vpack.c.bf16 %v17_v40, %v17_v40  ;;  %v599_v43 = vld [vmem:[%s757_s1 + $0x118] sm:$0xff]  }
   0xc   :  { %506 = vmatprep.subr.bf16.mxu0 %v578_v12  ;;  %v593_v27 = vld [vmem:[%s757_s1 + $0x88] sm:$0xff]   ;;  %v597_v33 = vld [vmem:[%s757_s1 + $0x80] sm:$0xff]   ;;  %407 = vmatprep.mubr.bf16.mxu1 %v23_v38  ;;  %v600_v44 = vld [vmem:[%s757_s1 + $0x110] sm:$0xff]  }
   0xd   :  { %527 = vmatpush3.bf16.msra.mxu1 %v577_v11  ;;  %v16_v31 = vld [vmem:[%s758_s0 + $0x8] sm:$0xff]  ;;  %v15_v34 = vld [vmem:[%s758_s0] sm:$0xff] }
   0xe   :  { %528 = vmatprep.subr.bf16.mxu1 %v580_v14  ;;  %v21_v32 = vpack.c.bf16 %v16_v31, %v16_v31  ;;  %v20_v37 = vpack.c.bf16 %v15_v34, %v15_v34  ;;  %v598_v39 = vld [vmem:[%s757_s1 + $0x120] sm:$0x3f]   ;;  %v601_v45 = vld [vmem:[%s757_s1 + $0x108] sm:$0xff]  }
   0xf   :  { %507 = vmatpush3.bf16.msra.mxu0 %v579_v13  ;;  %v333_v41 = vsel %vm331_vm0, %v598_v39, 0  ;;  %v602_v46 = vld [vmem:[%s757_s1 + $0x100] sm:$0xff]  }
  0x10   :  { %508 = vmatprep.subr.bf16.mxu0 %v582_v16  ;;  %367 = vmatprep.mubr.bf16.mxu0 %v21_v32  ;;  %v19_v47 = vld [vmem:[%s758_s0 + $0x20] sm:$0xff] }
  0x11   :  { %529 = vmatpush3.bf16.msra.mxu1 %v581_v15  ;;  %v24_v48 = vpack.c.bf16 %v19_v47, %v19_v47  ;;  %v461_v58 = vld [vmem:[%s759_s2] ss:$0 sm:$0xff] }
  0x12   :  { %530 = vmatprep.subr.bf16.mxu1 %v584_v18 }
  0x13   :  { %509 = vmatpush3.bf16.msra.mxu0 %v583_v17 }
  0x14   :  { %510 = vmatprep.subr.bf16.mxu0 %v586_v20 }
  0x15   :  { %531 = vmatpush3.bf16.msra.mxu1 %v585_v19 }
  0x16   :  { %532 = vmatprep.subr.bf16.mxu1 %v588_v22 }
  0x17   :  { %511 = vmatpush3.bf16.msra.mxu0 %v587_v21 }
  0x18   :  { %512 = vmatprep.subr.bf16.mxu0 %v590_v24 }
  0x19   :  { %533 = vmatpush3.bf16.msra.mxu1 %v589_v23 }
  0x1a   :  { %534 = vmatprep.subr.bf16.mxu1 %v592_v26 }
  0x1b   :  { %513 = vmatpush3.bf16.msra.mxu0 %v591_v25 }
  0x1c   :  { %514 = vmatprep.subr.bf16.mxu0 %v594_v28 }
  0x1d   :  { %535 = vmatpush3.bf16.msra.mxu1 %v593_v27 }
  0x1e   :  { %536 = vmatprep.subr.bf16.mxu1 %v596_v30 }
  0x1f   :  { %515 = vmatpush3.bf16.msra.mxu0 %v595_v29 }
  0x20   :  { %550 = vmatprep.subr.bf16.mxu0 %v603_v35 }
  0x21   :  { %537 = vmatpush3.bf16.msra.mxu1 %v597_v33 }
  0x22   :  { %368 = vmatmul.mubr.bf16.vlgmr.msra.gmra.mxu0 %v20_v37 }
  0x23   :  { %551 = vmatpush3.bf16.msra.mxu0 %v333_v41  ;;  %560 = vmatprep.mubr.msk.bf16.mxu0 %vm604_vm1, %v603_v35 }
  0x24   :  { %408 = vmatmul.mubr.bf16.vlgmr.msra.gmra.mxu1 %v22_v42  ;;  %552 = vmatprep.subr.bf16.mxu0 %v603_v35 }
  0x27   :  { %553 = vmatpush3.bf16.msra.mxu0 %v599_v43 }
  0x28   :  { %554 = vmatprep.subr.bf16.mxu0 %v603_v35 }
  0x2b   :  { %555 = vmatpush3.bf16.msra.mxu0 %v600_v44 }
  0x2c   :  { %556 = vmatprep.subr.bf16.mxu0 %v603_v35 }
  0x2f   :  { %557 = vmatpush3.bf16.msra.mxu0 %v601_v45 }
  0x30   :  { %558 = vmatprep.subr.bf16.mxu0 %v603_v35 }
  0x33   :  { %559 = vmatpush3.bf16.msra.mxu0 %v602_v46 }
  0x36   :  { %561 = vmatmul.mubr.msk.bf16.vlgmr.msra.gmra.mxu0 %vm327_vm2, %v24_v48 }
  0xe2   :  { %v516_v49 = vpop.f32.mrf.mxu0 }
  0xe4   :  { %v517_v50 = vpop.f32.mrf.mxu0  ;;  %v538_v51 = vpop.f32.mrf.mxu1 }
  0xe5   :  { %v518_v57 = vadd.f32 %v517_v50, %v516_v49 }
  0xe6   :  { %v519_v52 = vpop.f32.mrf.mxu0  ;;  %v539_v53 = vpop.f32.mrf.mxu1 }
  0xe7   :  { %v370_v59 = vadd.f32 %v518_v57, %v461_v58  ;;  %v540_v60 = vadd.f32 %v539_v53, %v538_v51 }
  0xe8   :  { %v520_v54 = vpop.f32.mrf.mxu0  ;;  %v541_v55 = vpop.f32.mrf.mxu1 }
  0xe9   :  { %v410_v61 = vadd.f32 %v540_v60, %v370_v59 }
  0xea   :  { %v542_v56 = vpop.f32.mrf.mxu1 }
  0xf6   :  { %v449_v62 = vpop.f32.mrf.mxu0 }
  0xf7   :  { %v450_v63 = vadd.f32 %v449_v62, %v410_v61 }
  0xf8   :  { %v562_v0 = vpop.f32.mrf.mxu0 }
  0xf9   :  { %456 = vst.msk [vmem:[%s760_s3] sm:$0xff] %vm455_vm3, %v450_v63 }
  0xfa   :  { %v452_v1 = vpop.f32.mrf.mxu0 }
  0xfc   :  { %v563_v2 = vpop.f32.mrf.mxu0 }

// kernel: dinov2_forward.28
= control target key start
LH: loop header
LB: loop body
LE: loop exit
PB: predicated region body
PF: predicated region fallthrough
CT: control target
= control target key end

     0   :  { %vm19_vm0 = vcmask 261120   ;;  %vm26_vm1 = vcmask 254976   ;;  %s147_s0 = inlined_call_operand.vmem [shape: f32[18,32], index: 0, kind: input, shape index: {}]   ;;  %s148_s1 = inlined_call_operand.vmem [shape: f32[1,32], index: 1, kind: input, shape index: {}]   ;;  %s149_s2 = inlined_call_operand.vmem [shape: f32[1,32], index: 2, kind: input, shape index: {}]   ;;  %s150_s3 = inlined_call_operand.vmem [shape: f32[18,32], index: 3, kind: output, shape index: {}]  }
   0x1   :  { %v14_v0 = vld [vmem:[%s147_s0] sm:$0xff]  ;;  %v16_v1 = vld [vmem:[%s147_s0 + $0x10] sm:$0x3]  ;;  %v15_v2 = vld [vmem:[%s147_s0 + $0x8] sm:$0xff] }
   0x2   :  { %v20_v3 = vsel %vm19_vm0, %v14_v0, 0.0  ;;  %v27_v4 = vsel %vm26_vm1, %v16_v1, 0.0  ;;  %v23_v5 = vsel %vm19_vm0, %v15_v2, 0.0  ;;  %v86_v31 = vld [vmem:[%s148_s1] ss:$0 sm:$0xff] }
   0x3   :  { %21 = vadd.xlane.f32.xlu0 %v20_v3  ;;  %28 = vadd.xlane.f32.xlu1 %v27_v4  ;;  %v87_v33 = vld [vmem:[%s149_s2] ss:$0 sm:$0xff] }
   0x7   :  { %24 = vadd.xlane.f32.xlu0 %v23_v5 }
  0x8c   :  { %v22_v6 = vpop.xlane.xlu0 %21  ;;  %v29_v7 = vpop.xlane.xlu1 %28 }
  0x8d   :  { %v31_v8 = vmul.f32 0.03125, %v22_v6  ;;  %v33_v9 = vmul.f32 0.03125, %v29_v7 }
  0x8f   :  { %v34_v10 = vsub.f32 %v14_v0, %v31_v8  ;;  %v36_v11 = vsub.f32 %v16_v1, %v33_v9 }
  0x90   :  { %v25_v12 = vpop.xlane.xlu0 %24 }
  0x91   :  { %v32_v13 = vmul.f32 0.03125, %v25_v12  ;;  %v37_v14 = vmul.f32 %v34_v10, %v34_v10  ;;  %v39_v15 = vmul.f32 %v36_v11, %v36_v11 }
  0x93   :  { %v35_v16 = vsub.f32 %v15_v2, %v32_v13  ;;  %v40_v17 = vsel %vm19_vm0, %v37_v14, 0.0  ;;  %v46_v18 = vsel %vm26_vm1, %v39_v15, 0.0 }
  0x94   :  { %41 = vadd.xlane.f32.xlu1 %v40_v17 }
  0x95   :  { %v38_v19 = vmul.f32 %v35_v16, %v35_v16 }
  0x97   :  { %v43_v20 = vsel %vm19_vm0, %v38_v19, 0.0 }
  0x98   :  { %47 = vadd.xlane.f32.xlu1 %v46_v18  ;;  %44 = vadd.xlane.f32.xlu0 %v43_v20 }
 0x11d   :  { %v42_v21 = vpop.xlane.xlu1 %41 }
 0x11e   :  { %v49_v22 = vmul.f32 0.03125, %v42_v21 }
 0x120   :  { %v52_v23 = vadd.f32 1e-06, %v49_v22 }
 0x121   :  { %v48_v24 = vpop.xlane.xlu1 %47  ;;  %v45_v25 = vpop.xlane.xlu0 %44 }
 0x122   :  { %88 = vrsqrt.f32 %v52_v23  ;;  %v51_v26 = vmul.f32 0.03125, %v48_v24  ;;  %v50_v27 = vmul.f32 0.03125, %v45_v25 }
 0x124   :  { %v54_v28 = vadd.f32 1e-06, %v51_v26  ;;  %v53_v29 = vadd.f32 1e-06, %v50_v27 }
 0x126   :  { %90 = vrsqrt.f32 %v54_v28 }
 0x127   :  { %92 = vrsqrt.f32 %v53_v29 }
 0x12f   :  { %v89_v30 = vpop.eup %88 }
 0x130   :  { %v58_v32 = vmul.f32 %v89_v30, %v34_v10 }
 0x132   :  { %v67_v34 = vmul.f32 %v86_v31, %v58_v32 }
 0x133   :  { %v91_v35 = vpop.eup %90 }
 0x134   :  { %v93_v36 = vpop.eup %92  ;;  %v76_v37 = vadd.f32 %v87_v33, %v67_v34  ;;  %v60_v38 = vmul.f32 %v91_v35, %v36_v11 }
 0x135   :  { %v59_v39 = vmul.f32 %v93_v36, %v35_v16 }
 0x136   :  { %79 = vst.msk [vmem:[%s150_s3] sm:$0xff] %vm19_vm0, %v76_v37  ;;  %v69_v40 = vmul.f32 %v86_v31, %v60_v38 }
 0x137   :  { %v68_v41 = vmul.f32 %v86_v31, %v59_v39 }
 0x138   :  { %v78_v42 = vadd.f32 %v87_v33, %v69_v40 }
 0x139   :  { %v77_v43 = vadd.f32 %v87_v33, %v68_v41 }
 0x13a   :  { %81 = vst.msk [vmem:[%s150_s3 + $0x10] sm:$0x3] %vm26_vm1, %v78_v42 }
 0x13b   :  { %80 = vst.msk [vmem:[%s150_s3 + $0x8] sm:$0xff] %vm19_vm0, %v77_v43 }

// kernel: dinov2_forward.23
= control target key start
LH: loop header
LB: loop body
LE: loop exit
PB: predicated region body
PF: predicated region fallthrough
CT: control target
= control target key end

     0   :  { %vm35_vm0 = vcmask 261120   ;;  %vm42_vm1 = vcmask 254976   ;;  %s557_s0 = inlined_call_operand.vmem [shape: f32[18,32], index: 0, kind: input, shape index: {}, may-alias: {0,8}]   ;;  %s558_s3 = inlined_call_operand.vmem [shape: bf16[32,128], index: 3, kind: input, shape index: {}]   ;;  %s559_s1 = inlined_call_operand.vmem [shape: f32[1,32], index: 1, kind: input, shape index: {}]   ;;  %s560_s2 = inlined_call_operand.vmem [shape: f32[1,32], index: 2, kind: input, shape index: {}]   ;;  %s561_s5 = inlined_call_operand.vmem [shape: bf16[128,32], index: 5, kind: input, shape index: {}]   ;;  %s562_s4 = inlined_call_operand.vmem [shape: f32[1,128], index: 4, kind: input, shape index: {}]   ;;  %s563_s6 = inlined_call_operand.vmem [shape: f32[1,32], index: 6, kind: input, shape index: {}]   ;;  %s564_s7 = inlined_call_operand.vmem [shape: f32[1,32], index: 7, kind: input, shape index: {}]   ;;  %s565_s8 = inlined_call_operand.vmem [shape: f32[18,32], index: 8, kind: output, shape index: {}, may-alias: {0,8}]  }
   0x1   :  { %v471_v0 = vld [vmem:[%s557_s0] sm:$0xff]  ;;  %v476_v1 = vld [vmem:[%s557_s0 + $0x10] sm:$0x3]  ;;  %v481_v2 = vld [vmem:[%s557_s0 + $0x8] sm:$0xff] }
   0x2   :  { %v36_v3 = vsel %vm35_vm0, %v471_v0, 0.0  ;;  %v43_v4 = vsel %vm42_vm1, %v476_v1, 0.0  ;;  %v39_v5 = vsel %vm35_vm0, %v481_v2, 0.0  ;;  %v401_v21 = vld [vmem:[%s558_s3 + $0x8] sm:$0xff]   ;;  %v402_v22 = vld [vmem:[%s558_s3] sm:$0xff]   ;;  %v403_v48 = vld [vmem:[%s561_s5 + $0x38] sm:$0xff]  }
   0x3   :  { %37 = vadd.xlane.f32.xlu0 %v36_v3  ;;  %44 = vadd.xlane.f32.xlu1 %v43_v4  ;;  %v342_v34 = vld [vmem:[%s559_s1] ss:$0 sm:$0xff]  ;;  %v404_v49 = vld [vmem:[%s561_s5 + $0x30] sm:$0xff]   ;;  %v405_v50 = vld [vmem:[%s561_s5 + $0x28] sm:$0xff]  }
   0x4   :  { %373 = vmatprep.subr.bf16.mxu0 %v401_v21  ;;  %v343_v40 = vld [vmem:[%s560_s2] ss:$0 sm:$0xff]  ;;  %381 = vmatprep.subr.bf16.mxu1 %v403_v48  ;;  %v407_v52 = vld [vmem:[%s561_s5 + $0x18] sm:$0xff]   ;;  %v408_v53 = vld [vmem:[%s561_s5 + $0x10] sm:$0xff]  }
   0x5   :  { %374 = vmatpush3.bf16.msra.mxu0 %v401_v21  ;;  %382 = vmatpush3.bf16.msra.mxu1 %v403_v48  ;;  %v406_v51 = vld [vmem:[%s561_s5 + $0x20] sm:$0xff]   ;;  %v409_v54 = vld [vmem:[%s561_s5 + $0x8] sm:$0xff]  }
   0x6   :  { %375 = vmatprep.subr.bf16.mxu0 %v402_v22  ;;  %383 = vmatprep.subr.bf16.mxu1 %v404_v49  ;;  %v410_v55 = vld [vmem:[%s561_s5] sm:$0xff]  }
   0x7   :  { %40 = vadd.xlane.f32.xlu0 %v39_v5  ;;  %v344_v56 = vld [vmem:[%s562_s4] ss:$0 sm:$0xff] }
   0x9   :  { %376 = vmatpush3.bf16.msra.mxu0 %v402_v22  ;;  %384 = vmatpush3.bf16.msra.mxu1 %v404_v49 }
   0xa   :  { %385 = vmatprep.subr.bf16.mxu1 %v405_v50 }
   0xd   :  { %386 = vmatpush3.bf16.msra.mxu1 %v405_v50 }
   0xe   :  { %387 = vmatprep.subr.bf16.mxu1 %v406_v51 }
  0x11   :  { %388 = vmatpush3.bf16.msra.mxu1 %v406_v51 }
  0x12   :  { %389 = vmatprep.subr.bf16.mxu1 %v407_v52 }
  0x15   :  { %390 = vmatpush3.bf16.msra.mxu1 %v407_v52 }
  0x16   :  { %391 = vmatprep.subr.bf16.mxu1 %v408_v53 }
  0x19   :  { %392 = vmatpush3.bf16.msra.mxu1 %v408_v53 }
  0x1a   :  { %393 = vmatprep.subr.bf16.mxu1 %v409_v54 }
  0x1d   :  { %394 = vmatpush3.bf16.msra.mxu1 %v409_v54 }
  0x1e   :  { %395 = vmatprep.subr.bf16.mxu1 %v410_v55 }
  0x21   :  { %396 = vmatpush3.bf16.msra.mxu1 %v410_v55 }
  0x8c   :  { %v38_v6 = vpop.xlane.xlu0 %37  ;;  %v45_v7 = vpop.xlane.xlu1 %44 }
  0x8d   :  { %v47_v8 = vmul.f32 0.03125, %v38_v6  ;;  %v49_v9 = vmul.f32 0.03125, %v45_v7 }
  0x8f   :  { %v50_v10 = vsub.f32 %v471_v0, %v47_v8  ;;  %v52_v11 = vsub.f32 %v476_v1, %v49_v9 }
  0x90   :  { %v41_v12 = vpop.xlane.xlu0 %40 }
  0x91   :  { %v48_v13 = vmul.f32 0.03125, %v41_v12  ;;  %v53_v14 = vmul.f32 %v50_v10, %v50_v10  ;;  %v55_v15 = vmul.f32 %v52_v11, %v52_v11 }
  0x93   :  { %v51_v16 = vsub.f32 %v481_v2, %v48_v13  ;;  %v56_v17 = vsel %vm35_vm0, %v53_v14, 0.0  ;;  %v62_v18 = vsel %vm42_vm1, %v55_v15, 0.0 }
  0x94   :  { %57 = vadd.xlane.f32.xlu1 %v56_v17 }
  0x95   :  { %v54_v19 = vmul.f32 %v51_v16, %v51_v16 }
  0x97   :  { %v59_v20 = vsel %vm35_vm0, %v54_v19, 0.0 }
  0x98   :  { %63 = vadd.xlane.f32.xlu1 %v62_v18  ;;  %60 = vadd.xlane.f32.xlu0 %v59_v20 }
 0x11d   :  { %v58_v23 = vpop.xlane.xlu1 %57 }
 0x11e   :  { %v65_v24 = vmul.f32 0.03125, %v58_v23 }
 0x120   :  { %v68_v25 = vadd.f32 1e-06, %v65_v24 }
 0x121   :  { %v64_v26 = vpop.xlane.xlu1 %63  ;;  %v61_v27 = vpop.xlane.xlu0 %60 }
 0x122   :  { %411 = vrsqrt.f32 %v68_v25  ;;  %v67_v28 = vmul.f32 0.03125, %v64_v26  ;;  %v66_v29 = vmul.f32 0.03125, %v61_v27 }
 0x124   :  { %v70_v30 = vadd.f32 1e-06, %v67_v28  ;;  %v69_v31 = vadd.f32 1e-06, %v66_v29 }
 0x126   :  { %413 = vrsqrt.f32 %v70_v30 }
 0x127   :  { %415 = vrsqrt.f32 %v69_v31 }
 0x12f   :  { %v412_v32 = vpop.eup %411 }
 0x130   :  { %v74_v33 = vmul.f32 %v412_v32, %v50_v10  ;;  %v349_v32 = vld [vmem:[%s563_s6] ss:$0 sm:$0xff] }
 0x132   :  { %v83_v39 = vmul.f32 %v342_v34, %v74_v33 }
 0x133   :  { %v414_v35 = vpop.eup %413 }
 0x134   :  { %v416_v36 = vpop.eup %415  ;;  %v76_v37 = vmul.f32 %v414_v35, %v52_v11  ;;  %v92_v44 = vadd.f32 %v343_v40, %v83_v39 }
 0x135   :  { %v75_v38 = vmul.f32 %v416_v36, %v51_v16 }
 0x136   :  { %v85_v41 = vmul.f32 %v342_v34, %v76_v37 }
 0x137   :  { %v84_v42 = vmul.f32 %v342_v34, %v75_v38  ;;  %v358_v34 = vld [vmem:[%s564_s7] ss:$0 sm:$0xff] }
 0x138   :  { %v94_v43 = vadd.f32 %v343_v40, %v85_v41 }
 0x139   :  { %v93_v45 = vadd.f32 %v343_v40, %v84_v42 }
 0x13a   :  { %v96_v46 = vpack.c.bf16 %v94_v43, %v94_v43 }
 0x13b   :  { %v95_v47 = vpack.c.bf16 %v93_v45, %v92_v44 }
 0x13d   :  { %377 = vmatprep.mubr.msk.bf16.mxu0 %vm35_vm0, %v95_v47 }
 0x13e   :  { %378 = vmatmul.mubr.msk.bf16.vlgmr.msra.gmra.mxu0 %vm35_vm0, %v96_v46 }
 0x1fe   :  { %v379_v57 = vpop.f32.mrf.mxu0 }
 0x1ff   :  { %v169_v58 = vadd.f32 %v379_v57, %v344_v56 }
 0x200   :  { %v160_v59 = vpop.f32.mrf.mxu0 }
 0x201   :  { %v176_v60 = vmul.f32 %v169_v58, %v169_v58  ;;  %v161_v61 = vadd.f32 %v344_v56, %v160_v59 }
 0x202   :  { %v380_v62 = vpop.f32.mrf.mxu0 }
 0x203   :  { %v179_v63 = vmul.f32 %v176_v60, %v169_v58  ;;  %v174_v3 = vmul.f32 %v161_v61, %v161_v61 }
 0x204   :  { %v163_v4 = vpop.f32.mrf.mxu0 }
 0x205   :  { %v182_v5 = vmul.f32 0.044715, %v179_v63  ;;  %v177_v6 = vmul.f32 %v174_v3, %v161_v61  ;;  %v164_v7 = vadd.f32 %v344_v56, %v163_v4 }
 0x207   :  { %v185_v8 = vadd.f32 %v182_v5, %v169_v58  ;;  %v180_v9 = vmul.f32 0.044715, %v177_v6  ;;  %v175_v10 = vmul.f32 %v164_v7, %v164_v7 }
 0x209   :  { %v188_v11 = vmul.f32 0.7978846, %v185_v8  ;;  %v183_v12 = vadd.f32 %v180_v9, %v161_v61  ;;  %v178_v13 = vmul.f32 %v175_v10, %v164_v7 }
 0x20b   :  { %417 = vtanh.f32 %v188_v11  ;;  %v181_v14 = vmul.f32 0.044715, %v178_v13  ;;  %v186_v15 = vmul.f32 0.7978846, %v183_v12 }
 0x20d   :  { %v184_v16 = vadd.f32 %v181_v14, %v164_v7  ;;  %419 = vtanh.f32 %v186_v15 }
 0x20f   :  { %v187_v17 = vmul.f32 0.7978846, %v184_v16 }
 0x211   :  { %421 = vtanh.f32 %v187_v17 }
 0x218   :  { %v418_v18 = vpop.eup %417 }
 0x219   :  { %v194_v20 = vadd.f32 1.0, %v418_v18 }
 0x21a   :  { %v420_v19 = vpop.eup %419 }
 0x21b   :  { %v192_v21 = vadd.f32 1.0, %v420_v19  ;;  %v197_v23 = vmul.f32 0.5, %v194_v20 }
 0x21d   :  { %v195_v25 = vmul.f32 0.5, %v192_v21  ;;  %v200_v27 = vmul.f32 %v197_v23, %v169_v58 }
 0x21e   :  { %v422_v22 = vpop.eup %421 }
 0x21f   :  { %v193_v24 = vadd.f32 1.0, %v422_v22  ;;  %v198_v28 = vmul.f32 %v195_v25, %v161_v61  ;;  %v202_v31 = vpack.c.bf16 %v200_v27, %v200_v27 }
 0x221   :  { %v196_v26 = vmul.f32 0.5, %v193_v24 }
 0x223   :  { %v199_v29 = vmul.f32 %v196_v26, %v164_v7 }
 0x225   :  { %v201_v30 = vpack.c.bf16 %v199_v29, %v198_v28 }
 0x227   :  { %397 = vmatprep.mubr.bf16.mxu1 %v201_v30 }
 0x228   :  { %398 = vmatmul.mubr.bf16.vlgmr.msra.gmra.mxu1 %v202_v31 }
 0x2e8   :  { %v399_v33 = vpop.f32.mrf.mxu1 }
 0x2e9   :  { %v317_v35 = vadd.f32 %v399_v33, %v349_v32 }
 0x2ea   :  { %v308_v36 = vpop.f32.mrf.mxu1 }
 0x2eb   :  { %v331_v37 = vmul.f32 %v358_v34, %v317_v35  ;;  %v309_v38 = vadd.f32 %v349_v32, %v308_v36 }
 0x2ec   :  { %v400_v39 = vpop.f32.mrf.mxu1 }
 0x2ed   :  { %v334_v40 = vadd.f32 %v331_v37, %v476_v1  ;;  %v329_v41 = vmul.f32 %v358_v34, %v309_v38 }
 0x2ee   :  { %v311_v42 = vpop.f32.mrf.mxu1 }
 0x2ef   :  { %337 = vst.msk [vmem:[%s565_s8 + $0x10] sm:$0x3] %vm42_vm1, %v334_v40  ;;  %v332_v43 = vadd.f32 %v329_v41, %v471_v0  ;;  %v312_v44 = vadd.f32 %v349_v32, %v311_v42 }
 0x2f1   :  { %335 = vst.msk [vmem:[%s565_s8] sm:$0xff] %vm35_vm0, %v332_v43  ;;  %v330_v45 = vmul.f32 %v358_v34, %v312_v44 }
 0x2f3   :  { %v333_v46 = vadd.f32 %v330_v45, %v481_v2 }
 0x2f5   :  { %336 = vst.msk [vmem:[%s565_s8 + $0x8] sm:$0xff] %vm35_vm0, %v333_v46 }

</bundles_post_ra>
